<compile_context>
chip_gen: v7x
topology: tpu7x:2x2x1
jax: 0.10.0
libtpu: 0.0.40
codegen_flags: <defaults>
</compile_context>

<pallas_src>
import functools

import jax
import jax.numpy as jnp
import numpy as np
from jax import lax
from jax.experimental import pallas as pl
from jax.experimental.pallas import tpu as pltpu


# ---------------------------------------------------------------------------
# small helpers
# ---------------------------------------------------------------------------
def _tile(dim, pref):
    """Largest divisor of `dim` that is <= pref (keeps BlockSpecs exactly divisible).

    TODO(synk): pad ragged dims instead of requiring exact divisibility.
    """
    t = max(1, min(int(pref), dim))
    while dim % t:
        t -= 1
    return t


def _parallel_tile(dim, pref):
    """Like _tile but prefer >= 2 blocks along a 'parallel' grid axis so both
    TensorCores of a v7x chip get work (perf feedback)."""
    t = _tile(dim, pref)
    if t == dim and dim >= 16 and dim % 2 == 0:
        t = dim // 2
    return t


def _vmem_limit(nbytes):
    """Explicit scoped-VMEM budget (perf feedback: set vmem_limit_bytes rather
    than rely on defaults), clamped well under v7x's 64 MiB physical VMEM."""
    return int(min(max(4 * nbytes, 16 * 2**20), 48 * 2**20))


# ---------------------------------------------------------------------------
# Unbalanced-Sinkhorn scaling vectors (shared by the fused and split kernels).
# Mirrors POT ot.unbalanced.sinkhorn_unbalanced(method='sinkhorn') on M = -A
# with uniform marginals:  K = exp(A/reg), fi = reg_m/(reg_m+reg),
#   u = (a / (K v))^fi ,  v = (b / (K^T u))^fi ,  plan = u * K * v
# ---------------------------------------------------------------------------
def _sinkhorn_uv(kmat, a_marg, b_marg, fi, n_iter, tol):
    """All f32.  Early termination: once max|u_new - u| < tol the two O(n*m)
    passes are skipped.  Implemented as lax.cond inside lax.fori_loop (chosen
    over lax.while_loop for maximally robust Mosaic lowering); a skipped
    iteration costs only a scalar compare + branch."""
    n, m = kmat.shape

    def update(carry):
        u, v, _ = carry
        kv = jnp.sum(kmat * v, axis=1, keepdims=True)                      # (n, 1)
        u_new = jnp.exp(fi * jnp.log(a_marg / jnp.maximum(kv, 1e-30)))
        ktu = jnp.sum(kmat * u_new, axis=0, keepdims=True)                 # (1, m)
        v_new = jnp.exp(fi * jnp.log(b_marg / jnp.maximum(ktu, 1e-30)))
        return u_new, v_new, jnp.max(jnp.abs(u_new - u))

    def body(_, carry):
        return lax.cond(carry[2] > tol, update, lambda c: c, carry)

    u0 = jnp.ones((n, 1), jnp.float32)
    v0 = jnp.ones((1, m), jnp.float32)
    err0 = jnp.array(jnp.inf, jnp.float32)
    u, v, _ = lax.fori_loop(0, n_iter, body, (u0, v0, err0))
    # TODO(synk): the two contractions could run as MXU matvecs
    # (lax.dot_general (n,m)x(m,1) / (1,n)x(n,m)); with early termination the
    # loop is only a handful of iterations, so the VPU/XLU form is kept here —
    # benchmark the MXU variant at production n, m.
    return u, v


# ---------------------------------------------------------------------------
# FUSED path: one grid-less kernel does cosine -> Sinkhorn -> T @ X in VMEM.
# ---------------------------------------------------------------------------
def _fused_aligner_kernel(x_ref, y_ref, xinv_ref, yinv_ref, delta_ref, o_ref,
                          *, reg, reg_m, n_iter, tol):
    n, _ = x_ref.shape
    m, _ = y_ref.shape

    # bf16 copies feed the MXU (perf feedback); xb is reused by both dots.
    xb = x_ref[...].astype(jnp.bfloat16)
    yb = y_ref[...].astype(jnp.bfloat16)

    # A = cosine similarity: contract the trailing feature axis of BOTH tiles
    # (no transposes), f32 accumulation, f32 inverse-norm epilogue.
    a_sim = lax.dot_general(xb, yb,
                            dimension_numbers=(((1,), (1,)), ((), ())),
                            preferred_element_type=jnp.float32)
    a_sim = a_sim * xinv_ref[...] * yinv_ref[...]                           # (n, m) f32

    # Unbalanced Sinkhorn on M = -A (kept entirely in f32).
    fi = reg_m / (reg_m + reg)
    kmat = jnp.exp(a_sim * (1.0 / reg))
    u, v = _sinkhorn_uv(kmat, 1.0 / n, 1.0 / m, fi, n_iter, tol)

    # T = A * W + delta ;  X_aligned = T @ X  (bf16 MXU dot, f32 accumulate).
    t_plan = (a_sim * (u * kmat * v) + delta_ref[...]).astype(jnp.bfloat16)
    o_ref[...] = jnp.dot(t_plan, xb,
                         preferred_element_type=jnp.float32).astype(o_ref.dtype)


def _fused_vmem_need(n, m, d):
    # f32 blocks (x, y, delta, out, norms) + live f32 temps (A, K, W-ish) + bf16 copies.
    return 4 * (2 * n * d + m * d + 4 * n * m + n + m) + 2 * (n * d + m * d + n * m)


def _fused_forward(x, y, delta_ot, *, reg, reg_m, n_iter, tol):
    n, d = x.shape
    m, _ = y.shape
    # Tiny row-norm prologue (plain XLA; one extra read of X/Y, negligible).
    # TODO(synk): torch F.cosine_similarity clamps the norm at eps=1e-8; here the
    # squared norm is clamped at 1e-12 — only differs for near-zero rows.
    x_inv = lax.rsqrt(jnp.maximum(jnp.sum(x * x, axis=1, keepdims=True), 1e-12))     # (n, 1)
    y_inv = lax.rsqrt(jnp.maximum(jnp.sum(y * y, axis=1, keepdims=True), 1e-12)).T   # (1, m)

    kernel = functools.partial(_fused_aligner_kernel,
                               reg=reg, reg_m=reg_m, n_iter=n_iter, tol=tol)
    # Grid-less single invocation: every operand/result sits in VMEM exactly
    # once (no pipeline, no double buffering) — this is the "fuse the three
    # pallas_calls" feedback item.
    return pl.pallas_call(
        kernel,
        out_shape=jax.ShapeDtypeStruct((n, d), x.dtype),
        compiler_params=pltpu.CompilerParams(
            vmem_limit_bytes=_vmem_limit(_fused_vmem_need(n, m, d))),
        cost_estimate=pl.CostEstimate(
            flops=4 * n * m * d + 6 * n * m + 4 * n * m * n_iter,
            transcendentals=n * m + 2 * n_iter * (n + m),
            bytes_accessed=4 * (2 * n * d + m * d + n * m + n + m)),
    )(x, y, x_inv, y_inv, delta_ot)


# ---------------------------------------------------------------------------
# SPLIT path, kernel 1: pairwise cosine similarity, tiled (M, N, K), K last.
# bf16 MXU operands, f32 VMEM accumulator, inverse-norm epilogue at k == last.
# ---------------------------------------------------------------------------
def _pairwise_cosine_kernel(x_ref, y_ref, xinv_ref, yinv_ref, a_ref, acc_ref):
    k = pl.program_id(2)

    @pl.when(k == 0)
    def _init():
        acc_ref[...] = jnp.zeros_like(acc_ref)

    # Contract the trailing feature axis of BOTH tiles so Y is consumed as stored.
    # TODO(synk): on v5e, verify the bundle dump has no per-k-step vxpose of the
    # (tn, tk) Y tile; if it does, pre-transpose Y once at the call boundary.
    acc_ref[...] += lax.dot_general(
        x_ref[...].astype(jnp.bfloat16), y_ref[...].astype(jnp.bfloat16),
        dimension_numbers=(((1,), (1,)), ((), ())),
        preferred_element_type=jnp.float32)

    @pl.when(k == pl.num_programs(2) - 1)
    def _finalize():
        a_ref[...] = (acc_ref[...] * xinv_ref[...] * yinv_ref[...]).astype(a_ref.dtype)


def pairwise_cosine(x, y, *, tm=256, tn=256, tk=512):
    n, d = x.shape
    m, d2 = y.shape
    assert d == d2
    tm, tn, tk = _parallel_tile(n, tm), _tile(m, tn), _tile(d, tk)

    x_inv = lax.rsqrt(jnp.maximum(jnp.sum(x * x, axis=1, keepdims=True), 1e-12))     # (n, 1)
    y_inv = lax.rsqrt(jnp.maximum(jnp.sum(y * y, axis=1, keepdims=True), 1e-12)).T   # (1, m)

    grid = (n // tm, m // tn, d // tk)
    return pl.pallas_call(
        _pairwise_cosine_kernel,
        out_shape=jax.ShapeDtypeStruct((n, m), jnp.float32),
        grid_spec=pltpu.PrefetchScalarGridSpec(
            num_scalar_prefetch=0,
            grid=grid,
            in_specs=[
                pl.BlockSpec((tm, tk), lambda i, j, k: (i, k)),
                pl.BlockSpec((tn, tk), lambda i, j, k: (j, k)),
                pl.BlockSpec((tm, 1), lambda i, j, k: (i, 0)),
                pl.BlockSpec((1, tn), lambda i, j, k: (0, j)),
            ],
            out_specs=pl.BlockSpec((tm, tn), lambda i, j, k: (i, j)),
            scratch_shapes=[pltpu.VMEM((tm, tn), jnp.float32)],
        ),
        compiler_params=pltpu.CompilerParams(
            dimension_semantics=("parallel", "parallel", "arbitrary")),
        cost_estimate=pl.CostEstimate(
            flops=2 * n * m * d,
            transcendentals=0,
            bytes_accessed=4 * (n * d + m * d + n * m + n + m)),
    )(x, y, x_inv, y_inv)


# ---------------------------------------------------------------------------
# SPLIT path, kernel 2: single-block unbalanced Sinkhorn that also materializes
# T = A * W + delta so the downstream matmul streams ONE (n, m) matrix.
# ---------------------------------------------------------------------------
def _transport_plan_kernel(a_ref, delta_ref, t_ref, *, reg, reg_m, n_iter, tol):
    n, m = a_ref.shape
    fi = reg_m / (reg_m + reg)
    # Only K = exp(A/reg) stays live across the loop; A is re-read from its
    # resident VMEM input block in the epilogue (VMEM-footprint feedback).
    kmat = jnp.exp(a_ref[...].astype(jnp.float32) * (1.0 / reg))
    u, v = _sinkhorn_uv(kmat, 1.0 / n, 1.0 / m, fi, n_iter, tol)
    # TODO(synk): torch detaches only W (.data); forward values are identical here,
    # but a training port must keep the W-only stop-gradient via a custom VJP.
    t_ref[...] = (a_ref[...] * (u * kmat * v) + delta_ref[...]).astype(t_ref.dtype)


def transport_plan(a_sim, delta_ot, *, reg, reg_m, n_iter, tol):
    n, m = a_sim.shape
    assert delta_ot.shape == (n, m)
    kernel = functools.partial(_transport_plan_kernel,
                               reg=reg, reg_m=reg_m, n_iter=n_iter, tol=tol)
    # Grid-less single invocation: whole (n, m) blocks live in VMEM exactly once
    # (avoids the Buffered(2) double-buffering waste of a grid=(1,) pipeline).
    return pl.pallas_call(
        kernel,
        out_shape=jax.ShapeDtypeStruct((n, m), jnp.float32),
        compiler_params=pltpu.CompilerParams(vmem_limit_bytes=_vmem_limit(4 * 5 * n * m)),
        cost_estimate=pl.CostEstimate(
            flops=4 * n * m * n_iter + 4 * n * m,
            transcendentals=n * m + 2 * n_iter * (n + m),
            bytes_accessed=4 * 3 * n * m),
    )(a_sim, delta_ot)


# ---------------------------------------------------------------------------
# SPLIT path, kernel 3: X_aligned = T @ X, plain tiled MXU matmul (bf16 in,
# f32 VMEM accumulator, write-out at k == last).
# ---------------------------------------------------------------------------
def _align_matmul_kernel(t_ref, x_ref, o_ref, acc_ref):
    k = pl.program_id(2)

    @pl.when(k == 0)
    def _init():
        acc_ref[...] = jnp.zeros_like(acc_ref)

    acc_ref[...] += jnp.dot(t_ref[...].astype(jnp.bfloat16),
                            x_ref[...].astype(jnp.bfloat16),
                            preferred_element_type=jnp.float32)

    @pl.when(k == pl.num_programs(2) - 1)
    def _finalize():
        o_ref[...] = acc_ref[...].astype(o_ref.dtype)


def aligned_matmul(t_plan, x, *, tm=256, tn=512, tk=512):
    n, m = t_plan.shape
    m2, d = x.shape
    assert m == m2
    tm, tn, tk = _parallel_tile(n, tm), _tile(d, tn), _tile(m, tk)
    grid = (n // tm, d // tn, m // tk)
    return pl.pallas_call(
        _align_matmul_kernel,
        out_shape=jax.ShapeDtypeStruct((n, d), x.dtype),
        grid_spec=pltpu.PrefetchScalarGridSpec(
            num_scalar_prefetch=0,
            grid=grid,
            in_specs=[
                pl.BlockSpec((tm, tk), lambda i, j, k: (i, k)),
                pl.BlockSpec((tk, tn), lambda i, j, k: (k, j)),
            ],
            out_specs=pl.BlockSpec((tm, tn), lambda i, j, k: (i, j)),
            scratch_shapes=[pltpu.VMEM((tm, tn), jnp.float32)],
        ),
        compiler_params=pltpu.CompilerParams(
            dimension_semantics=("parallel", "parallel", "arbitrary")),
        cost_estimate=pl.CostEstimate(
            flops=2 * n * d * m,
            transcendentals=0,
            bytes_accessed=4 * (n * m + m * d + n * d)),
    )(t_plan, x)


# ---------------------------------------------------------------------------
# TokenAlignerOT.forward
# ---------------------------------------------------------------------------
_FUSED_VMEM_BUDGET = 24 * 2**20   # conservative vs v7x's 32 MiB scoped default


@functools.partial(jax.jit, static_argnames=("reg", "reg_m", "n_iter", "tol", "force_split"))
def token_aligner_ot_forward(x, y, delta_ot, *, reg=0.1, reg_m=0.001, n_iter=100,
                             tol=1e-6, force_split=False):
    """A = cos(X, Y); W = unbalanced-Sinkhorn OT of -A; out = (A*W + delta) @ X."""
    n, d = x.shape
    m, d2 = y.shape
    assert d == d2 and delta_ot.shape == (n, m)
    assert n == m, "torch.mm(T, X) in the reference module requires source_len == target_len"

    if not force_split and _fused_vmem_need(n, m, d) <= _FUSED_VMEM_BUDGET:
        return _fused_forward(x, y, delta_ot, reg=reg, reg_m=reg_m, n_iter=n_iter, tol=tol)

    a_sim = pairwise_cosine(x, y)
    t_plan = transport_plan(a_sim, delta_ot, reg=reg, reg_m=reg_m, n_iter=n_iter, tol=tol)
    return aligned_matmul(t_plan, x)


if __name__ == "__main__":
    key = jax.random.PRNGKey(0)
    k_x, k_y, k_d = jax.random.split(key, 3)

    # source_token_len must equal target_token_len for torch.mm(T, X) in the reference.
    source_token_len = 128
    target_token_len = 128
    emb_dim = 512
    reg, reg_m, n_iter = 0.1, 0.001, 100

    x = jax.random.normal(k_x, (source_token_len, emb_dim), jnp.float32)
    y = jax.random.normal(k_y, (target_token_len, emb_dim), jnp.float32)
    # nn.init.xavier_uniform_ on (source, target)
    bound = float(np.sqrt(6.0 / (source_token_len + target_token_len)))
    delta_ot = jax.random.uniform(k_d, (source_token_len, target_token_len),
                                  jnp.float32, -bound, bound)

    out_fused = jax.block_until_ready(
        token_aligner_ot_forward(x, y, delta_ot, reg=reg, reg_m=reg_m, n_iter=n_iter))
    out_split = jax.block_until_ready(
        token_aligner_ot_forward(x, y, delta_ot, reg=reg, reg_m=reg_m, n_iter=n_iter,
                                 force_split=True))
    assert out_fused.shape == (source_token_len, emb_dim)
    assert out_split.shape == (source_token_len, emb_dim)

    # ---- float64 numpy reference of the same forward pass -------------------
    xn = np.asarray(x, np.float64)
    yn = np.asarray(y, np.float64)
    dn = np.asarray(delta_ot, np.float64)
    a_ref = (xn / np.linalg.norm(xn, axis=1, keepdims=True)) @ \
            (yn / np.linalg.norm(yn, axis=1, keepdims=True)).T
    kmat = np.exp(a_ref / reg)
    fi = reg_m / (reg_m + reg)
    a_m = 1.0 / source_token_len
    b_m = 1.0 / target_token_len
    u = np.ones((source_token_len, 1))
    v = np.ones((1, target_token_len))
    for _ in range(n_iter):
        u = (a_m / (kmat * v).sum(axis=1, keepdims=True)) ** fi
        v = (b_m / (kmat * u).sum(axis=0, keepdims=True)) ** fi
    w_ref = u * kmat * v
    ref = (a_ref * w_ref + dn) @ xn

    # Tolerance covers the bf16 MXU operands (f32 accumulate) plus exp(A/reg)
    # amplification in the f32 Sinkhorn solve.
    for name, out in (("fused", out_fused), ("split", out_split)):
        got = np.asarray(out, np.float64)
        err = float(np.max(np.abs(got - ref)))
        assert np.allclose(got, ref, rtol=5e-2, atol=5e-2), (name, err)

    print("KERNEL_OK")
</pallas_src>

<mosaic_0001>
module attributes {stable_mosaic.version = 11 : i64} {
  func.func @_fused_aligner_kernel(%arg0: memref<128x512xf32, #tpu.memory_space<vmem>>, %arg1: memref<128x512xf32, #tpu.memory_space<vmem>>, %arg2: memref<128x1xf32, #tpu.memory_space<vmem>>, %arg3: memref<1x128xf32, #tpu.memory_space<vmem>>, %arg4: memref<128x128xf32, #tpu.memory_space<vmem>>, %arg5: memref<128x512xf32, #tpu.memory_space<vmem>>) attributes {dimension_semantics = [], scalar_prefetch = 0 : i64, scratch_operands = 0 : i64, tpu.core_type = #tpu.core_type<tc>} {
    %c0 = arith.constant 0 : index
    %c0_0 = arith.constant 0 : index
    %0 = vector.load %arg0[%c0, %c0_0] : memref<128x512xf32, #tpu.memory_space<vmem>>, vector<128x512xf32>
    %1 = arith.truncf %0 : vector<128x512xf32> to vector<128x512xbf16>
    %c0_1 = arith.constant 0 : index
    %c0_2 = arith.constant 0 : index
    %2 = vector.load %arg1[%c0_1, %c0_2] : memref<128x512xf32, #tpu.memory_space<vmem>>, vector<128x512xf32>
    %3 = arith.truncf %2 : vector<128x512xf32> to vector<128x512xbf16>
    %cst = arith.constant dense<0.000000e+00> : vector<128x128xf32>
    %4 = tpu.matmul %1, %3, %cst {dimension_numbers = #tpu.dot_dimension_numbers<[1], [1], [0], [0], [0, 0, 1, 0], [], []>} : vector<128x512xbf16>, vector<128x512xbf16>, vector<128x128xf32> -> vector<128x128xf32>
    %c0_3 = arith.constant 0 : index
    %c0_4 = arith.constant 0 : index
    %5 = vector.load %arg2[%c0_3, %c0_4] : memref<128x1xf32, #tpu.memory_space<vmem>>, vector<128x1xf32>
    %6 = vector.broadcast %5 : vector<128x1xf32> to vector<128x128xf32>
    %7 = arith.mulf %4, %6 : vector<128x128xf32>
    %c0_5 = arith.constant 0 : index
    %c0_6 = arith.constant 0 : index
    %8 = vector.load %arg3[%c0_5, %c0_6] : memref<1x128xf32, #tpu.memory_space<vmem>>, vector<1x128xf32>
    %9 = vector.broadcast %8 : vector<1x128xf32> to vector<128x128xf32>
    %10 = arith.mulf %7, %9 : vector<128x128xf32>
    %cst_7 = arith.constant 1.000000e+01 : f32
    %11 = vector.broadcast %cst_7 : f32 to vector<128x128xf32>
    %12 = arith.mulf %10, %11 : vector<128x128xf32>
    %13 = math.exp %12 : vector<128x128xf32>
    %cst_8 = arith.constant 1.000000e+00 : f32
    %14 = vector.broadcast %cst_8 : f32 to vector<128x1xf32>
    %cst_9 = arith.constant 1.000000e+00 : f32
    %15 = vector.broadcast %cst_9 : f32 to vector<1x128xf32>
    %cst_10 = arith.constant 0x7F800000 : f32
    %c0_i32 = arith.constant 0 : i32
    %c100_i32 = arith.constant 100 : i32
    %16 = arith.addi %c0_i32, %c100_i32 : i32
    %c1_i32 = arith.constant 1 : i32
    %17:3 = scf.for %arg6 = %c0_i32 to %16 step %c1_i32 iter_args(%arg7 = %14, %arg8 = %15, %arg9 = %cst_10) -> (vector<128x1xf32>, vector<1x128xf32>, f32)  : i32 {
      %cst_16 = arith.constant 9.99999997E-7 : f32
      %28 = arith.cmpf ogt, %arg9, %cst_16 : f32
      %29 = arith.extui %28 : i1 to i32
      %c0_i32_17 = arith.constant 0 : i32
      %30 = arith.cmpi ne, %29, %c0_i32_17 : i32
      %31:3 = scf.if %30 -> (vector<128x1xf32>, vector<1x128xf32>, f32) {
        %32 = vector.broadcast %arg8 : vector<1x128xf32> to vector<128x128xf32>
        %33 = arith.mulf %13, %32 : vector<128x128xf32>
        %cst_18 = arith.constant dense<0.000000e+00> : vector<128xf32>
        %34 = vector.multi_reduction <add>, %33, %cst_18 [1] : vector<128x128xf32> to vector<128xf32>
        %35 = vector.shape_cast %34 : vector<128xf32> to vector<128x1xf32>
        %cst_19 = arith.constant 1.000000e-30 : f32
        %36 = vector.broadcast %cst_19 : f32 to vector<128x1xf32>
        %37 = arith.maximumf %35, %36 : vector<128x1xf32>
        %cst_20 = arith.constant 7.812500e-03 : f32
        %38 = vector.broadcast %cst_20 : f32 to vector<128x1xf32>
        %39 = arith.divf %38, %37 : vector<128x1xf32>
        %40 = math.log %39 : vector<128x1xf32>
        %cst_21 = arith.constant 9.900990e-03 : f32
        %41 = vector.broadcast %cst_21 : f32 to vector<128x1xf32>
        %42 = arith.mulf %41, %40 : vector<128x1xf32>
        %43 = math.exp %42 : vector<128x1xf32>
        %44 = vector.broadcast %43 : vector<128x1xf32> to vector<128x128xf32>
        %45 = arith.mulf %13, %44 : vector<128x128xf32>
        %cst_22 = arith.constant dense<0.000000e+00> : vector<128xf32>
        %46 = vector.multi_reduction <add>, %45, %cst_22 [0] : vector<128x128xf32> to vector<128xf32>
        %47 = vector.shape_cast %46 : vector<128xf32> to vector<1x128xf32>
        %cst_23 = arith.constant 1.000000e-30 : f32
        %48 = vector.broadcast %cst_23 : f32 to vector<1x128xf32>
        %49 = arith.maximumf %47, %48 : vector<1x128xf32>
        %cst_24 = arith.constant 7.812500e-03 : f32
        %50 = vector.broadcast %cst_24 : f32 to vector<1x128xf32>
        %51 = arith.divf %50, %49 : vector<1x128xf32>
        %52 = math.log %51 : vector<1x128xf32>
        %cst_25 = arith.constant 9.900990e-03 : f32
        %53 = vector.broadcast %cst_25 : f32 to vector<1x128xf32>
        %54 = arith.mulf %53, %52 : vector<1x128xf32>
        %55 = math.exp %54 : vector<1x128xf32>
        %56 = arith.subf %43, %arg7 : vector<128x1xf32>
        %57 = math.absf %56 : vector<128x1xf32>
        %58 = vector.shape_cast %57 : vector<128x1xf32> to vector<1x128x1xf32>
        %cst_26 = arith.constant dense<0xFF800000> : vector<1xf32>
        %59 = vector.multi_reduction <maximumf>, %58, %cst_26 [1, 2] : vector<1x128x1xf32> to vector<1xf32>
        %60 = vector.shape_cast %59 : vector<1xf32> to vector<1x1x1xf32>
        %61 = vector.extract %60[0, 0, 0] : f32 from vector<1x1x1xf32>
        scf.yield %43, %55, %61 : vector<128x1xf32>, vector<1x128xf32>, f32
      } else {
        scf.yield %arg7, %arg8, %arg9 : vector<128x1xf32>, vector<1x128xf32>, f32
      }
      scf.yield %31#0, %31#1, %31#2 : vector<128x1xf32>, vector<1x128xf32>, f32
    }
    %18 = vector.broadcast %17#0 : vector<128x1xf32> to vector<128x128xf32>
    %19 = arith.mulf %18, %13 : vector<128x128xf32>
    %20 = vector.broadcast %17#1 : vector<1x128xf32> to vector<128x128xf32>
    %21 = arith.mulf %19, %20 : vector<128x128xf32>
    %22 = arith.mulf %10, %21 : vector<128x128xf32>
    %c0_11 = arith.constant 0 : index
    %c0_12 = arith.constant 0 : index
    %23 = vector.load %arg4[%c0_11, %c0_12] : memref<128x128xf32, #tpu.memory_space<vmem>>, vector<128x128xf32>
    %24 = arith.addf %22, %23 : vector<128x128xf32>
    %25 = arith.truncf %24 : vector<128x128xf32> to vector<128x128xbf16>
    %cst_13 = arith.constant dense<0.000000e+00> : vector<128x512xf32>
    %26 = tpu.matmul %25, %1, %cst_13 {dimension_numbers = #tpu.dot_dimension_numbers<[1], [0], [0], [1], [0, 0, 1, 1], [], []>} : vector<128x128xbf16>, vector<128x512xbf16>, vector<128x512xf32> -> vector<128x512xf32>
    %c0_14 = arith.constant 0 : index
    %c0_15 = arith.constant 0 : index
    %27 = vector.load %arg5[%c0_14, %c0_15] : memref<128x512xf32, #tpu.memory_space<vmem>>, vector<128x512xf32>
    tpu.vector_store %arg5[%c0_14, %c0_15], %26 {strides = array<i32>} : memref<128x512xf32, #tpu.memory_space<vmem>>, vector<128x512xf32>,
    return
  }
}

</mosaic_0001>

<bundles_post_ra>
// kernel: token_aligner_ot_forward.1
= control target key start
LH: loop header
LB: loop body
LE: loop exit
PB: predicated region body
PF: predicated region fallthrough
CT: control target
= control target key end

     0   :  { %10 = vsyncpa [#allocation3], 0  ;;  %v3591_v58 = vmov 0   ;;  %s3585_s0 = inlined_call_operand.vmem [shape: f32[128,512], index: 0, kind: input, shape index: {}]   ;;  %s3586_s1 = inlined_call_operand.vmem [shape: f32[128,512], index: 1, kind: input, shape index: {}]   ;;  %s3587_s2 = inlined_call_operand.vmem [shape: f32[128,1], index: 2, kind: input, shape index: {}]   ;;  %s3588_s3 = inlined_call_operand.vmem [shape: f32[1,128], index: 3, kind: input, shape index: {}]   ;;  %s3589_s4 = inlined_call_operand.vmem [shape: f32[128,128], index: 4, kind: input, shape index: {}]   ;;  %s3590_s5 = inlined_call_operand.hbm [shape: f32[128,512], index: 5, kind: output, shape index: {}]  }
   0x1   :  { %v119_v0 = vld [vmem:[%s3586_s1 + $0x8] sm:$0xff]  ;;  %v118_v3 = vld [vmem:[%s3586_s1] sm:$0xff]  ;;  %v121_v50 = vld [vmem:[%s3586_s1 + $0x18] sm:$0xff]  ;;  %1809 = vset.pattern.permute.xlu0 %v3591_v58  ;;  %1810 = vset.pattern.permute.xlu1 %v3591_v58 }
   0x2   :  { %v123_v1 = vld [vmem:[%s3586_s1 + $0x28] sm:$0xff]  ;;  %v122_v4 = vld [vmem:[%s3586_s1 + $0x20] sm:$0xff]  ;;  %v125_v51 = vld [vmem:[%s3586_s1 + $0x38] sm:$0xff] }
   0x3   :  { %v183_v2 = vpack.c.bf16 %v123_v1, %v119_v0  ;;  %v127_v5 = vld [vmem:[%s3586_s1 + $0x48] sm:$0xff]  ;;  %v182_v6 = vpack.c.bf16 %v122_v4, %v118_v3  ;;  %v126_v9 = vld [vmem:[%s3586_s1 + $0x40] sm:$0xff]  ;;  %v185_v53 = vpack.c.bf16 %v125_v51, %v121_v50  ;;  %v120_v57 = vld [vmem:[%s3586_s1 + $0x10] sm:$0xff] }
   0x4   :  { %v131_v7 = vld [vmem:[%s3586_s1 + $0x68] sm:$0xff]  ;;  %v130_v10 = vld [vmem:[%s3586_s1 + $0x60] sm:$0xff]  ;;  %v410_v59 = vld [vmem:[%s3587_s2 + $0x10] sm:$0xff] }
   0x5   :  { %214 = vmatprep.subr.bf16.mxu0 %v183_v2  ;;  %v187_v8 = vpack.c.bf16 %v131_v7, %v127_v5  ;;  %v135_v11 = vld [vmem:[%s3586_s1 + $0x88] sm:$0xff]  ;;  %v186_v13 = vpack.c.bf16 %v130_v10, %v126_v9  ;;  %v134_v18 = vld [vmem:[%s3586_s1 + $0x80] sm:$0xff]  ;;  %v124_v60 = vld [vmem:[%s3586_s1 + $0x30] sm:$0xff]  ;;  %436 = vperm.xlu1 %1810, %v410_v59  }
   0x6   :  { %215 = vmatpush1.bf16.xpose.msra.mxu0 %v182_v6  ;;  %v139_v12 = vld [vmem:[%s3586_s1 + $0xa8] sm:$0xff]  ;;  %v138_v19 = vld [vmem:[%s3586_s1 + $0xa0] sm:$0xff]  ;;  %v129_v63 = vld [vmem:[%s3586_s1 + $0x58] sm:$0xff]  ;;  %v184_v3 = vpack.c.bf16 %v124_v60, %v120_v57 }
   0x7   :  { %216 = vmatprep.subr.bf16.mxu0 %v187_v8  ;;  %v191_v14 = vpack.c.bf16 %v139_v12, %v135_v11  ;;  %v23_v15 = vld [vmem:[%s3585_s0 + $0x8] sm:$0xff]  ;;  %v190_v22 = vpack.c.bf16 %v138_v19, %v134_v18  ;;  %v142_v24 = vld [vmem:[%s3586_s1 + $0xc0] sm:$0xff]  ;;  %v133_v0 = vld [vmem:[%s3586_s1 + $0x78] sm:$0xff] }
   0x8   :  { %v27_v16 = vld [vmem:[%s3585_s0 + $0x28] sm:$0xff]  ;;  %v146_v25 = vld [vmem:[%s3586_s1 + $0xe0] sm:$0xff]  ;;  %v411_v5 = vld [vmem:[%s3587_s2 + $0x18] sm:$0xff]  ;;  %v189_v6 = vpack.c.bf16 %v133_v0, %v129_v63 }
   0x9   :  { %v2344_v17 = vpack.c.bf16 %v27_v16, %v23_v15  ;;  %v143_v20 = vld [vmem:[%s3586_s1 + $0xc8] sm:$0xff]  ;;  %v194_v28 = vpack.c.bf16 %v146_v25, %v142_v24  ;;  %v150_v30 = vld [vmem:[%s3586_s1 + $0x100] sm:$0xff]  ;;  %441 = vperm.xlu1 %1810, %v411_v5   ;;  %v128_v10 = vld [vmem:[%s3586_s1 + $0x50] sm:$0xff] }
   0xa   :  { %v147_v21 = vld [vmem:[%s3586_s1 + $0xe8] sm:$0xff]  ;;  %v154_v31 = vld [vmem:[%s3586_s1 + $0x120] sm:$0xff]  ;;  %v132_v12 = vld [vmem:[%s3586_s1 + $0x70] sm:$0xff] }
   0xb   :  { %246 = vmatprep.mubr.bf16.mxu0 %v2344_v17  ;;  %v195_v23 = vpack.c.bf16 %v147_v21, %v143_v20  ;;  %v151_v26 = vld [vmem:[%s3586_s1 + $0x108] sm:$0xff]  ;;  %v198_v34 = vpack.c.bf16 %v154_v31, %v150_v30  ;;  %v158_v36 = vld [vmem:[%s3586_s1 + $0x140] sm:$0xff]  ;;  %v137_v15 = vld [vmem:[%s3586_s1 + $0x98] sm:$0xff]  ;;  %v188_v20 = vpack.c.bf16 %v132_v12, %v128_v10 }
   0xc   :  { %v155_v27 = vld [vmem:[%s3586_s1 + $0x128] sm:$0xff]  ;;  %v162_v37 = vld [vmem:[%s3586_s1 + $0x160] sm:$0xff]  ;;  %v141_v16 = vld [vmem:[%s3586_s1 + $0xb8] sm:$0xff] }
   0xd   :  { %v199_v29 = vpack.c.bf16 %v155_v27, %v151_v26  ;;  %v159_v32 = vld [vmem:[%s3586_s1 + $0x148] sm:$0xff]  ;;  %v202_v40 = vpack.c.bf16 %v162_v37, %v158_v36  ;;  %v166_v42 = vld [vmem:[%s3586_s1 + $0x180] sm:$0xff]  ;;  %v414_v18 = vld [vmem:[%s3587_s2 + $0x30] sm:$0xff] }
   0xe   :  { %217 = vmatpush1.bf16.xpose.msra.mxu0 %v186_v13  ;;  %v163_v33 = vld [vmem:[%s3586_s1 + $0x168] sm:$0xff]  ;;  %v170_v43 = vld [vmem:[%s3586_s1 + $0x1a0] sm:$0xff]  ;;  %v136_v27 = vld [vmem:[%s3586_s1 + $0x90] sm:$0xff] }
   0xf   :  { %218 = vmatprep.subr.bf16.mxu0 %v191_v14  ;;  %v203_v35 = vpack.c.bf16 %v163_v33, %v159_v32  ;;  %v167_v38 = vld [vmem:[%s3586_s1 + $0x188] sm:$0xff]  ;;  %v206_v46 = vpack.c.bf16 %v170_v43, %v166_v42  ;;  %v174_v48 = vld [vmem:[%s3586_s1 + $0x1c0] sm:$0xff]  ;;  %v145_v32 = vld [vmem:[%s3586_s1 + $0xd8] sm:$0xff] }
  0x10   :  { %v171_v39 = vld [vmem:[%s3586_s1 + $0x1a8] sm:$0xff]  ;;  %v178_v49 = vld [vmem:[%s3586_s1 + $0x1e0] sm:$0xff]  ;;  %v149_v33 = vld [vmem:[%s3586_s1 + $0xf8] sm:$0xff] }
  0x11   :  { %v207_v41 = vpack.c.bf16 %v171_v39, %v167_v38  ;;  %v175_v44 = vld [vmem:[%s3586_s1 + $0x1c8] sm:$0xff]  ;;  %v210_v52 = vpack.c.bf16 %v178_v49, %v174_v48  ;;  %v22_v54 = vld [vmem:[%s3585_s0] sm:$0xff]  ;;  %v419_v38 = vld [vmem:[%s3587_s2 + $0x58] sm:$0xff]  ;;  %v197_v39 = vpack.c.bf16 %v149_v33, %v145_v32 }
  0x12   :  { %v179_v45 = vld [vmem:[%s3586_s1 + $0x1e8] sm:$0xff]  ;;  %v408_v55 = vld [vmem:[%s3587_s2] sm:$0xff]  ;;  %v144_v43 = vld [vmem:[%s3586_s1 + $0xd0] sm:$0xff] }
  0x13   :  { %v211_v47 = vpack.c.bf16 %v179_v45, %v175_v44  ;;  %v26_v56 = vld [vmem:[%s3585_s0 + $0x20] sm:$0xff]  ;;  %v31_v61 = vld [vmem:[%s3585_s0 + $0x48] sm:$0xff]  ;;  %426 = vperm.xlu0 %1809, %v408_v55   ;;  %v148_v45 = vld [vmem:[%s3586_s1 + $0xf0] sm:$0xff] }
  0x14   :  { %v35_v62 = vld [vmem:[%s3585_s0 + $0x68] sm:$0xff]  ;;  %v2454_v2 = vpack.c.bf16 %v26_v56, %v22_v54  ;;  %v412_v7 = vld [vmem:[%s3587_s2 + $0x20] sm:$0xff]  ;;  %v153_v48 = vld [vmem:[%s3586_s1 + $0x118] sm:$0xff] }
  0x15   :  { %v409_v1 = vld [vmem:[%s3587_s2 + $0x8] sm:$0xff]  ;;  %v2456_v4 = vpack.c.bf16 %v35_v62, %v31_v61  ;;  %v30_v8 = vld [vmem:[%s3585_s0 + $0x40] sm:$0xff]  ;;  %v157_v49 = vld [vmem:[%s3586_s1 + $0x138] sm:$0xff] }
  0x16   :  { %219 = vmatpush1.bf16.xpose.msra.mxu0 %v190_v22  ;;  %v34_v9 = vld [vmem:[%s3585_s0 + $0x60] sm:$0xff]  ;;  %v413_v11 = vld [vmem:[%s3587_s2 + $0x28] sm:$0xff]  ;;  %v415_v22 = vld [vmem:[%s3587_s2 + $0x38] sm:$0xff]  ;;  %v201_v55 = vpack.c.bf16 %v157_v49, %v153_v48 }
  0x17   :  { %220 = vmatprep.subr.bf16.mxu0 %v195_v23  ;;  %431 = vperm.xlu0 %1809, %v409_v1   ;;  %v39_v13 = vld [vmem:[%s3585_s0 + $0x88] sm:$0xff]  ;;  %v2496_v19 = vpack.c.bf16 %v34_v9, %v30_v8  ;;  %v193_v23 = vpack.c.bf16 %v141_v16, %v137_v15  ;;  %v416_v24 = vld [vmem:[%s3587_s2 + $0x40] sm:$0xff]  ;;  %v422_v50 = vld [vmem:[%s3587_s2 + $0x70] sm:$0xff] }
  0x18   :  { %v43_v14 = vld [vmem:[%s3585_s0 + $0xa8] sm:$0xff]  ;;  %451 = vperm.xlu1 %1810, %v413_v11   ;;  %v38_v25 = vld [vmem:[%s3585_s0 + $0x80] sm:$0xff]  ;;  %v423_v54 = vld [vmem:[%s3587_s2 + $0x78] sm:$0xff] }
  0x19   :  { %v2498_v21 = vpack.c.bf16 %v43_v14, %v39_v13  ;;  %v42_v26 = vld [vmem:[%s3585_s0 + $0xa0] sm:$0xff]  ;;  %v47_v30 = vld [vmem:[%s3585_s0 + $0xc8] sm:$0xff]  ;;  %v152_v59 = vld [vmem:[%s3586_s1 + $0x110] sm:$0xff] }
  0x1a   :  { %v51_v31 = vld [vmem:[%s3585_s0 + $0xe8] sm:$0xff]  ;;  %v50_v42 = vld [vmem:[%s3585_s0 + $0xe0] sm:$0xff]  ;;  %v156_v60 = vld [vmem:[%s3586_s1 + $0x130] sm:$0xff] }
  0x1b   :  { %446 = vperm.xlu0 %1809, %v412_v7   ;;  %v2540_v37 = vpack.c.bf16 %v51_v31, %v47_v30  ;;  %v421_v44 = vld [vmem:[%s3587_s2 + $0x68] sm:$0xff]  ;;  %v54_v56 = vld [vmem:[%s3585_s0 + $0x100] sm:$0xff]  ;;  %v161_v63 = vld [vmem:[%s3586_s1 + $0x158] sm:$0xff] }
  0x1c   :  { %461 = vperm.xlu1 %1810, %v415_v22   ;;  %v58_v57 = vld [vmem:[%s3585_s0 + $0x120] sm:$0xff]  ;;  %v63_v61 = vld [vmem:[%s3585_s0 + $0x148] sm:$0xff]  ;;  %v165_v0 = vld [vmem:[%s3586_s1 + $0x178] sm:$0xff] }
  0x1d   :  { %3651 = vst [vmem:[#allocation6_spill] sm:$0xff] %v2540_v37  ;;  %v67_v62 = vld [vmem:[%s3585_s0 + $0x168] sm:$0xff]  ;;  %v2613_v1 = vpack.c.bf16 %v58_v57, %v54_v56  ;;  %v62_v7 = vld [vmem:[%s3585_s0 + $0x140] sm:$0xff]  ;;  %v160_v9 = vld [vmem:[%s3586_s1 + $0x150] sm:$0xff] }
  0x1e   :  { %221 = vmatpush1.bf16.xpose.msra.mxu0 %v194_v28  ;;  %v417_v28 = vld [vmem:[%s3587_s2 + $0x48] sm:$0xff]  ;;  %v2615_v5 = vpack.c.bf16 %v67_v62, %v63_v61  ;;  %v66_v8 = vld [vmem:[%s3585_s0 + $0x160] sm:$0xff]  ;;  %v164_v10 = vld [vmem:[%s3586_s1 + $0x170] sm:$0xff] }
  0x1f   :  { %222 = vmatprep.subr.bf16.mxu0 %v199_v29  ;;  %456 = vperm.xlu0 %1809, %v414_v18   ;;  %v140_v29 = vld [vmem:[%s3586_s1 + $0xb0] sm:$0xff]  ;;  %3654 = vst [vmem:[#allocation9_spill] sm:$0xff] %v2613_v1  ;;  %v71_v11 = vld [vmem:[%s3585_s0 + $0x188] sm:$0xff]  ;;  %v169_v13 = vld [vmem:[%s3586_s1 + $0x198] sm:$0xff]  ;;  %v2643_v15 = vpack.c.bf16 %v66_v8, %v62_v7  ;;  %v204_v16 = vpack.c.bf16 %v164_v10, %v160_v9 }
  0x20   :  { %471 = vperm.xlu1 %1810, %v417_v28   ;;  %v192_v36 = vpack.c.bf16 %v140_v29, %v136_v27  ;;  %3655 = vst [vmem:[#allocation10_spill] sm:$0xff] %v2615_v5  ;;  %v75_v12 = vld [vmem:[%s3585_s0 + $0x1a8] sm:$0xff]  ;;  %v173_v14 = vld [vmem:[%s3586_s1 + $0x1b8] sm:$0xff]  ;;  %v70_v22 = vld [vmem:[%s3585_s0 + $0x180] sm:$0xff] }
  0x21   :  { %3656 = vst [vmem:[#allocation11_spill] sm:$0xff] %v2643_v15  ;;  %v2645_v18 = vpack.c.bf16 %v75_v12, %v71_v11  ;;  %v83_v27 = vld [vmem:[%s3585_s0 + $0x1e8] sm:$0xff]  ;;  %v177_v28 = vld [vmem:[%s3586_s1 + $0x1d8] sm:$0xff]  ;;  %v44_v61 = vld [vmem:[%s3585_s0 + $0xb0] sm:$0xff] }
  0x22   :  { %v181_v29 = vld [vmem:[%s3586_s1 + $0x1f8] sm:$0xff]  ;;  %v52_v7 = vld [vmem:[%s3585_s0 + $0xf0] sm:$0xff] }
  0x23   :  { %466 = vperm.xlu0 %1809, %v416_v24   ;;  %3657 = vst [vmem:[#allocation12_spill] sm:$0xff] %v2645_v18  ;;  %v168_v24 = vld [vmem:[%s3586_s1 + $0x190] sm:$0xff]  ;;  %v213_v33 = vpack.c.bf16 %v181_v29, %v177_v28  ;;  %v37_v48 = vld [vmem:[%s3585_s0 + $0x78] sm:$0xff] }
  0x24   :  { %481 = vperm.xlu1 %1810, %v419_v38   ;;  %v176_v38 = vld [vmem:[%s3586_s1 + $0x1d0] sm:$0xff]  ;;  %v45_v56 = vld [vmem:[%s3585_s0 + $0xb8] sm:$0xff] }
  0x25   :  { %v49_v62 = vld [vmem:[%s3585_s0 + $0xd8] sm:$0xff]  ;;  %v56_v12 = vld [vmem:[%s3585_s0 + $0x110] sm:$0xff] }
  0x26   :  { %223 = vmatpush1.bf16.xpose.msra.mxu0 %v198_v34  ;;  %v418_v34 = vld [vmem:[%s3587_s2 + $0x50] sm:$0xff]  ;;  %v57_v8 = vld [vmem:[%s3585_s0 + $0x118] sm:$0xff] }
  0x27   :  { %224 = vmatprep.subr.bf16.mxu0 %v203_v35  ;;  %v2538_v35 = vpack.c.bf16 %v42_v26, %v38_v25  ;;  %476 = vperm.xlu0 %1809, %v418_v34   ;;  %v172_v25 = vld [vmem:[%s3586_s1 + $0x1b0] sm:$0xff]  ;;  %v79_v26 = vld [vmem:[%s3585_s0 + $0x1c8] sm:$0xff]  ;;  %v78_v34 = vld [vmem:[%s3585_s0 + $0x1c0] sm:$0xff] }
  0x28   :  { %491 = vperm.xlu1 %1810, %v421_v44   ;;  %v208_v31 = vpack.c.bf16 %v172_v25, %v168_v24  ;;  %v2675_v32 = vpack.c.bf16 %v83_v27, %v79_v26  ;;  %v61_v9 = vld [vmem:[%s3585_s0 + $0x138] sm:$0xff]  ;;  %v68_v24 = vld [vmem:[%s3585_s0 + $0x170] sm:$0xff] }
  0x29   :  { %3650 = vst [vmem:[#allocation5_spill] sm:$0xff] %v2538_v35  ;;  %v2771_v11 = vpack.c.bf16 %v61_v9, %v57_v8  ;;  %v73_v25 = vld [vmem:[%s3585_s0 + $0x198] sm:$0xff]  ;;  %v72_v29 = vld [vmem:[%s3585_s0 + $0x190] sm:$0xff] }
  0x2a   :  { %3659 = vst [vmem:[#allocation14_spill] sm:$0xff] %v2675_v32  ;;  %v77_v26 = vld [vmem:[%s3585_s0 + $0x1b8] sm:$0xff] }
  0x2b   :  { %3669 = vst [vmem:[#allocation24_spill] sm:$0xff] %v2771_v11  ;;  %v2807_v28 = vpack.c.bf16 %v77_v26, %v73_v25 }
  0x2c   :  { %501 = vperm.xlu1 %1810, %v423_v54   ;;  %v36_v54 = vld [vmem:[%s3585_s0 + $0x70] sm:$0xff] }
  0x2d   :  { %3673 = vst [vmem:[#allocation28_spill] sm:$0xff] %v2807_v28 }
  0x2e   :  { %225 = vmatpush1.bf16.xpose.msra.mxu0 %v202_v40  ;;  %v420_v40 = vld [vmem:[%s3587_s2 + $0x60] sm:$0xff] }
  0x2f   :  { %226 = vmatprep.subr.bf16.mxu0 %v207_v41  ;;  %v46_v41 = vld [vmem:[%s3585_s0 + $0xc0] sm:$0xff]  ;;  %486 = vperm.xlu0 %1809, %v420_v40   ;;  %v25_v40 = vld [vmem:[%s3585_s0 + $0x18] sm:$0xff] }
  0x30   :  { %v2580_v51 = vpack.c.bf16 %v50_v42, %v46_v41  ;;  %v29_v41 = vld [vmem:[%s3585_s0 + $0x38] sm:$0xff] }
  0x31   :  { %v2699_v44 = vpack.c.bf16 %v29_v41, %v25_v40  ;;  %v84_v40 = vld [vmem:[%s3585_s0 + $0x1f0] sm:$0xff] }
  0x32   :  { %3652 = vst [vmem:[#allocation7_spill] sm:$0xff] %v2580_v51 }
  0x33   :  { %496 = vperm.xlu0 %1809, %v422_v50   ;;  %3661 = vst [vmem:[#allocation16_spill] sm:$0xff] %v2699_v44 }
  0x36   :  { %227 = vmatpush1.bf16.xpose.msra.mxu0 %v206_v46  ;;  %v55_v46 = vld [vmem:[%s3585_s0 + $0x108] sm:$0xff] }
  0x37   :  { %228 = vmatprep.subr.bf16.mxu0 %v211_v47  ;;  %v59_v47 = vld [vmem:[%s3585_s0 + $0x128] sm:$0xff] }
  0x3e   :  { %229 = vmatpush1.bf16.xpose.msra.mxu0 %v210_v52  ;;  %v196_v52 = vpack.c.bf16 %v148_v45, %v144_v43  ;;  %v24_v45 = vld [vmem:[%s3585_s0 + $0x10] sm:$0xff] }
  0x3f   :  { %311 = vmatprep.subr.bf16.mxu0 %v185_v53  ;;  %v2582_v53 = vpack.c.bf16 %v59_v47, %v55_v46  ;;  %v28_v46 = vld [vmem:[%s3585_s0 + $0x30] sm:$0xff]  ;;  %v33_v47 = vld [vmem:[%s3585_s0 + $0x58] sm:$0xff] }
  0x40   :  { %v2715_v49 = vpack.c.bf16 %v28_v46, %v24_v45  ;;  %v2717_v50 = vpack.c.bf16 %v37_v48, %v33_v47  ;;  %v2841_v46 = vld [vmem:[%s3588_s3] ss:$0 sm:$0xff]  ;;  %s2975_s3 = smov 0  }
  0x41   :  { %3653 = vst [vmem:[#allocation8_spill] sm:$0xff] %v2582_v53 }
  0x42   :  { %3662 = vst [vmem:[#allocation17_spill] sm:$0xff] %v2715_v49  ;;  %3663 = vst [vmem:[#allocation18_spill] sm:$0xff] %v2717_v50 }
  0x45   :  { %247 = vmatmul.mubr.bf16.vlgmr.msra.gmra.mrb[0].mxu0 %v2454_v2 }
  0x46   :  { %312 = vmatpush1.bf16.xpose.msra.mxu0 %v184_v3  ;;  %254 = vmatprep.mubr.bf16.mxu0 %v2456_v4  ;;  %v200_v3 = vpack.c.bf16 %v156_v60, %v152_v59  ;;  %v40_v60 = vld [vmem:[%s3585_s0 + $0x90] sm:$0xff] }
  0x47   :  { %313 = vmatprep.subr.bf16.mxu0 %v189_v6  ;;  %v205_v6 = vpack.c.bf16 %v165_v0, %v161_v63  ;;  %v53_v63 = vld [vmem:[%s3585_s0 + $0xf8] sm:$0xff]  ;;  %v2751_v0 = vpack.c.bf16 %v44_v61, %v40_v60 }
  0x49   :  { %3666 = vst [vmem:[#allocation21_spill] sm:$0xff] %v2751_v0 }
  0x4d   :  { %255 = vmatmul.mubr.bf16.gmra.mrb[4].mxu0 %v2496_v19 }
  0x4e   :  { %314 = vmatpush1.bf16.xpose.msra.mxu0 %v188_v20  ;;  %262 = vmatprep.mubr.bf16.mxu0 %v2498_v21  ;;  %v209_v20 = vpack.c.bf16 %v173_v14, %v169_v13  ;;  %v60_v13 = vld [vmem:[%s3585_s0 + $0x130] sm:$0xff]  ;;  %v65_v14 = vld [vmem:[%s3585_s0 + $0x158] sm:$0xff] }
  0x4f   :  { %315 = vmatprep.subr.bf16.mxu0 %v193_v23  ;;  %v74_v23 = vld [vmem:[%s3585_s0 + $0x1a0] sm:$0xff] }
  0x50   :  { %v2673_v30 = vpack.c.bf16 %v74_v23, %v70_v22  ;;  %v64_v23 = vld [vmem:[%s3585_s0 + $0x150] sm:$0xff] }
  0x51   :  { %v2805_v27 = vpack.c.bf16 %v68_v24, %v64_v23 }
  0x52   :  { %3658 = vst [vmem:[#allocation13_spill] sm:$0xff] %v2673_v30 }
  0x53   :  { %3672 = vst [vmem:[#allocation27_spill] sm:$0xff] %v2805_v27 }
  0x55   :  { %263 = vmatmul.mubr.bf16.gmra.mrb[8].mxu0 %v2538_v35 }
  0x56   :  { %316 = vmatpush1.bf16.xpose.msra.mxu0 %v192_v36  ;;  %270 = vmatprep.mubr.bf16.mxu0 %v2540_v37  ;;  %v82_v36 = vld [vmem:[%s3585_s0 + $0x1e0] sm:$0xff] }
  0x57   :  { %317 = vmatprep.subr.bf16.mxu0 %v197_v39  ;;  %v180_v39 = vld [vmem:[%s3586_s1 + $0x1f0] sm:$0xff]  ;;  %v2697_v42 = vpack.c.bf16 %v82_v36, %v78_v34  ;;  %v85_v34 = vld [vmem:[%s3585_s0 + $0x1f8] sm:$0xff] }
  0x58   :  { %v212_v43 = vpack.c.bf16 %v180_v39, %v176_v38  ;;  %v80_v39 = vld [vmem:[%s3585_s0 + $0x1d0] sm:$0xff] }
  0x59   :  { %3660 = vst [vmem:[#allocation15_spill] sm:$0xff] %v2697_v42  ;;  %v2835_v41 = vpack.c.bf16 %v84_v40, %v80_v39 }
  0x5b   :  { %3676 = vst [vmem:[#allocation31_spill] sm:$0xff] %v2835_v41 }
  0x5d   :  { %271 = vmatmul.mubr.bf16.gmra.mrb[12].mxu0 %v2580_v51 }
  0x5e   :  { %318 = vmatpush1.bf16.xpose.msra.mxu0 %v196_v52  ;;  %278 = vmatprep.mubr.bf16.mxu0 %v2582_v53  ;;  %v32_v52 = vld [vmem:[%s3585_s0 + $0x50] sm:$0xff] }
  0x5f   :  { %319 = vmatprep.subr.bf16.mxu0 %v201_v55  ;;  %v41_v55 = vld [vmem:[%s3585_s0 + $0x98] sm:$0xff]  ;;  %v2733_v57 = vpack.c.bf16 %v36_v54, %v32_v52 }
  0x60   :  { %v2735_v59 = vpack.c.bf16 %v45_v56, %v41_v55 }
  0x61   :  { %3664 = vst [vmem:[#allocation19_spill] sm:$0xff] %v2733_v57 }
  0x62   :  { %3665 = vst [vmem:[#allocation20_spill] sm:$0xff] %v2735_v59 }
  0x65   :  { %279 = vmatmul.mubr.bf16.gmra.mrb[16].mxu0 %v2613_v1 }
  0x66   :  { %320 = vmatpush1.bf16.xpose.msra.mxu0 %v200_v3  ;;  %286 = vmatprep.mubr.bf16.mxu0 %v2615_v5  ;;  %v2753_v3 = vpack.c.bf16 %v53_v63, %v49_v62 }
  0x67   :  { %321 = vmatprep.subr.bf16.mxu0 %v205_v6  ;;  %v48_v6 = vld [vmem:[%s3585_s0 + $0xd0] sm:$0xff] }
  0x68   :  { %3667 = vst [vmem:[#allocation22_spill] sm:$0xff] %v2753_v3  ;;  %v2769_v10 = vpack.c.bf16 %v52_v7, %v48_v6 }
  0x6a   :  { %3668 = vst [vmem:[#allocation23_spill] sm:$0xff] %v2769_v10 }
  0x6d   :  { %287 = vmatmul.mubr.bf16.gmra.mrb[20].mxu0 %v2643_v15 }
  0x6e   :  { %322 = vmatpush1.bf16.xpose.msra.mxu0 %v204_v16  ;;  %294 = vmatprep.mubr.bf16.mxu0 %v2645_v18  ;;  %v69_v16 = vld [vmem:[%s3585_s0 + $0x178] sm:$0xff] }
  0x6f   :  { %323 = vmatprep.subr.bf16.mxu0 %v209_v20  ;;  %v2787_v20 = vpack.c.bf16 %v60_v13, %v56_v12  ;;  %v2789_v22 = vpack.c.bf16 %v69_v16, %v65_v14 }
  0x71   :  { %3670 = vst [vmem:[#allocation25_spill] sm:$0xff] %v2787_v20  ;;  %3671 = vst [vmem:[#allocation26_spill] sm:$0xff] %v2789_v22 }
  0x75   :  { %295 = vmatmul.mubr.bf16.gmra.mrb[24].mxu0 %v2673_v30 }
  0x76   :  { %324 = vmatpush1.bf16.xpose.msra.mxu0 %v208_v31  ;;  %302 = vmatprep.mubr.bf16.mxu0 %v2675_v32  ;;  %v76_v31 = vld [vmem:[%s3585_s0 + $0x1b0] sm:$0xff] }
  0x77   :  { %325 = vmatprep.subr.bf16.mxu0 %v213_v33  ;;  %v81_v33 = vld [vmem:[%s3585_s0 + $0x1d8] sm:$0xff]  ;;  %v2823_v36 = vpack.c.bf16 %v76_v31, %v72_v29  ;;  %s2939_s0 = smov inf  }
  0x78   :  { %v2825_v38 = vpack.c.bf16 %v85_v34, %v81_v33 }
  0x79   :  { %3674 = vst [vmem:[#allocation29_spill] sm:$0xff] %v2823_v36 }
  0x7a   :  { %3675 = vst [vmem:[#allocation30_spill] sm:$0xff] %v2825_v38 }
  0x7d   :  { %303 = vmatmul.mubr.bf16.gmra.mrb[28].mxu0 %v2697_v42 }
  0x7e   :  { %326 = vmatpush1.bf16.xpose.msra.mxu0 %v212_v43  ;;  %343 = vmatprep.mubr.bf16.mxu0 %v2699_v44 }
  0x84   :  { %v437_v61 = vpop.permute.xlu1 %436 }
  0x85   :  { %344 = vmatmul.mubr.bf16.vlgmr.msra.gmra.mrb[0].mxu0 %v2715_v49 }
  0x86   :  { %351 = vmatprep.mubr.bf16.mxu0 %v2717_v50 }
  0x88   :  { %v442_v14 = vpop.permute.xlu1 %441 }
  0x8d   :  { %352 = vmatmul.mubr.bf16.gmra.mrb[4].mxu0 %v2733_v57 }
  0x8e   :  { %359 = vmatprep.mubr.bf16.mxu0 %v2735_v59 }
  0x92   :  { %v427_v43 = vpop.permute.xlu0 %426 }
  0x95   :  { %360 = vmatmul.mubr.bf16.gmra.mrb[8].mxu0 %v2751_v0 }
  0x96   :  { %367 = vmatprep.mubr.bf16.mxu0 %v2753_v3  ;;  %v432_v47 = vpop.permute.xlu0 %431 }
  0x9a   :  { %v447_v34 = vpop.permute.xlu0 %446 }
  0x9d   :  { %368 = vmatmul.mubr.bf16.gmra.mrb[12].mxu0 %v2769_v10  ;;  %v2973_v10 = vmov 1.0  }
  0x9e   :  { %375 = vmatprep.mubr.bf16.mxu0 %v2771_v11  ;;  %v2971_v11 = vmov 1.0  }
  0xa5   :  { %376 = vmatmul.mubr.bf16.gmra.mrb[16].mxu0 %v2787_v20  ;;  %v2969_v20 = vmov 1.0  }
  0xa6   :  { %383 = vmatprep.mubr.bf16.mxu0 %v2789_v22  ;;  %v2967_v22 = vmov 1.0  }
  0xad   :  { %384 = vmatmul.mubr.bf16.gmra.mrb[20].mxu0 %v2805_v27 }
  0xae   :  { %391 = vmatprep.mubr.bf16.mxu0 %v2807_v28 }
  0xb5   :  { %392 = vmatmul.mubr.bf16.gmra.mrb[24].mxu0 %v2823_v36 }
  0xb6   :  { %399 = vmatprep.mubr.bf16.mxu0 %v2825_v38 }
  0xbd   :  { %400 = vmatmul.mubr.bf16.gmra.mrb[28].mxu0 %v2835_v41 }
 0x158   :  { %v345_v45 = vpop.f32.mrb[0].mxu0 }
 0x159   :  { %v504_v48 = vmul.f32 %v427_v43, %v345_v45  ;;  %v347_v52 = vpop.f32.mrb[1].mxu0 }
 0x15a   :  { %v348_v54 = vpop.f32.mrb[2].mxu0 }
 0x15b   :  { %v2844_v55 = vmul.f32 %v2841_v46, %v504_v48  ;;  %v505_v56 = vmul.f32 %v432_v47, %v348_v54  ;;  %v350_v60 = vpop.f32.mrb[3].mxu0  ;;  %v452_v47 = vpop.permute.xlu1 %451 }
 0x15d   :  { %3677 = vst [vmem:[#allocation32_spill] sm:$0xff] %v2844_v55  ;;  %v543_v62 = vmul.f32 10.0, %v2844_v55  ;;  %v2848_v63 = vmul.f32 %v2841_v46, %v505_v56 }
 0x15f   :  { %3678 = vst [vmem:[#allocation33_spill] sm:$0xff] %v2848_v63  ;;  %v559_v6 = vmul.f32 1.442695, %v543_v62  ;;  %v544_v7 = vmul.f32 10.0, %v2848_v63 }
 0x160   :  { %v353_v8 = vpop.f32.mrb[4].mxu0 }
 0x161   :  { %1811 = vpow2.f32 %v559_v6  ;;  %v561_v9 = vmul.f32 1.442695, %v544_v7  ;;  %v506_v12 = vmul.f32 %v437_v61, %v353_v8  ;;  %v355_v13 = vpop.f32.mrb[5].mxu0 }
 0x162   :  { %v356_v16 = vpop.f32.mrb[6].mxu0 }
 0x163   :  { %1813 = vpow2.f32 %v561_v9  ;;  %v2852_v23 = vmul.f32 %v2841_v46, %v506_v12  ;;  %v507_v24 = vmul.f32 %v442_v14, %v356_v16  ;;  %v358_v25 = vpop.f32.mrb[7].mxu0  ;;  %v457_v9 = vpop.permute.xlu0 %456 }
 0x165   :  { %3679 = vst [vmem:[#allocation34_spill] sm:$0xff] %v2852_v23  ;;  %v545_v26 = vmul.f32 10.0, %v2852_v23  ;;  %v2856_v29 = vmul.f32 %v2841_v46, %v507_v24  ;;  %v462_v24 = vpop.permute.xlu1 %461 }
 0x167   :  { %3680 = vst [vmem:[#allocation35_spill] sm:$0xff] %v2856_v29  ;;  %v563_v31 = vmul.f32 1.442695, %v545_v26  ;;  %v546_v33 = vmul.f32 10.0, %v2856_v29 }
 0x168   :  { %v361_v39 = vpop.f32.mrb[8].mxu0 }
 0x169   :  { %1815 = vpow2.f32 %v563_v31  ;;  %v565_v40 = vmul.f32 1.442695, %v546_v33  ;;  %v508_v43 = vmul.f32 %v447_v34, %v361_v39  ;;  %v363_v45 = vpop.f32.mrb[9].mxu0 }
 0x16a   :  { %v364_v48 = vpop.f32.mrb[10].mxu0 }
 0x16b   :  { %v2859_v52 = vpop.eup %1811  ;;  %1817 = vpow2.f32 %v565_v40  ;;  %v2862_v54 = vmul.f32 %v2841_v46, %v508_v43  ;;  %v509_v56 = vmul.f32 %v452_v47, %v364_v48  ;;  %v366_v60 = vpop.f32.mrb[11].mxu0 }
 0x16c   :  { %3681 = vst [vmem:[#allocation36_spill] sm:$0xff] %v2859_v52  ;;  %v467_v48 = vpop.permute.xlu0 %466 }
 0x16d   :  { %3682 = vst [vmem:[#allocation37_spill] sm:$0xff] %v2862_v54  ;;  %v2864_v61 = vpop.eup %1813  ;;  %v547_v62 = vmul.f32 10.0, %v2862_v54  ;;  %v2868_v6 = vmul.f32 %v2841_v46, %v509_v56 }
 0x16e   :  { %3683 = vst [vmem:[#allocation38_spill] sm:$0xff] %v2864_v61 }
 0x16f   :  { %3684 = vst [vmem:[#allocation39_spill] sm:$0xff] %v2868_v6  ;;  %v567_v7 = vmul.f32 1.442695, %v547_v62  ;;  %v548_v8 = vmul.f32 10.0, %v2868_v6 }
 0x170   :  { %v369_v12 = vpop.f32.mrb[12].mxu0 }
 0x171   :  { %1819 = vpow2.f32 %v567_v7  ;;  %v569_v13 = vmul.f32 1.442695, %v548_v8  ;;  %v510_v14 = vmul.f32 %v457_v9, %v369_v12  ;;  %v371_v16 = vpop.f32.mrb[13].mxu0  ;;  %v472_v8 = vpop.permute.xlu1 %471 }
 0x172   :  { %v372_v25 = vpop.f32.mrb[14].mxu0 }
 0x173   :  { %v2871_v26 = vpop.eup %1815  ;;  %1821 = vpow2.f32 %v569_v13  ;;  %v2874_v31 = vmul.f32 %v2841_v46, %v510_v14  ;;  %v511_v33 = vmul.f32 %v462_v24, %v372_v25  ;;  %v374_v34 = vpop.f32.mrb[15].mxu0 }
 0x174   :  { %3685 = vst [vmem:[#allocation40_spill] sm:$0xff] %v2871_v26 }
 0x175   :  { %3686 = vst [vmem:[#allocation41_spill] sm:$0xff] %v2874_v31  ;;  %v2876_v39 = vpop.eup %1817  ;;  %v549_v40 = vmul.f32 10.0, %v2874_v31  ;;  %v2880_v43 = vmul.f32 %v2841_v46, %v511_v33 }
 0x176   :  { %3687 = vst [vmem:[#allocation42_spill] sm:$0xff] %v2876_v39 }
 0x177   :  { %3688 = vst [vmem:[#allocation43_spill] sm:$0xff] %v2880_v43  ;;  %v571_v45 = vmul.f32 1.442695, %v549_v40  ;;  %v550_v47 = vmul.f32 10.0, %v2880_v43 }
 0x178   :  { %v377_v56 = vpop.f32.mrb[16].mxu0 }
 0x179   :  { %1823 = vpow2.f32 %v571_v45  ;;  %v573_v60 = vmul.f32 1.442695, %v550_v47  ;;  %v512_v62 = vmul.f32 %v467_v48, %v377_v56  ;;  %v379_v7 = vpop.f32.mrb[17].mxu0  ;;  %v477_v45 = vpop.permute.xlu0 %476 }
 0x17a   :  { %v380_v9 = vpop.f32.mrb[18].mxu0 }
 0x17b   :  { %v2883_v12 = vpop.eup %1819  ;;  %1825 = vpow2.f32 %v573_v60  ;;  %v2886_v13 = vmul.f32 %v2841_v46, %v512_v62  ;;  %v513_v14 = vmul.f32 %v472_v8, %v380_v9  ;;  %v382_v16 = vpop.f32.mrb[19].mxu0 }
 0x17c   :  { %3689 = vst [vmem:[#allocation44_spill] sm:$0xff] %v2883_v12  ;;  %v482_v62 = vpop.permute.xlu1 %481 }
 0x17d   :  { %3690 = vst [vmem:[#allocation45_spill] sm:$0xff] %v2886_v13  ;;  %v2888_v24 = vpop.eup %1821  ;;  %v551_v25 = vmul.f32 10.0, %v2886_v13  ;;  %v2892_v33 = vmul.f32 %v2841_v46, %v513_v14  ;;  %v2965_v13 = vmov 1.0  }
 0x17e   :  { %3691 = vst [vmem:[#allocation46_spill] sm:$0xff] %v2888_v24 }
 0x17f   :  { %3692 = vst [vmem:[#allocation47_spill] sm:$0xff] %v2892_v33  ;;  %v575_v34 = vmul.f32 1.442695, %v551_v25  ;;  %v552_v40 = vmul.f32 10.0, %v2892_v33  ;;  %v2963_v33 = vmov 1.0  }
 0x180   :  { %v385_v47 = vpop.f32.mrb[20].mxu0 }
 0x181   :  { %1827 = vpow2.f32 %v575_v34  ;;  %v577_v48 = vmul.f32 1.442695, %v552_v40  ;;  %v514_v56 = vmul.f32 %v477_v45, %v385_v47  ;;  %v387_v60 = vpop.f32.mrb[21].mxu0  ;;  %v487_v45 = vpop.permute.xlu0 %486 }
 0x182   :  { %v388_v7 = vpop.f32.mrb[22].mxu0 }
 0x183   :  { %v2895_v8 = vpop.eup %1823  ;;  %1829 = vpow2.f32 %v577_v48  ;;  %v2898_v9 = vmul.f32 %v2841_v46, %v514_v56  ;;  %v515_v16 = vmul.f32 %v482_v62, %v388_v7  ;;  %v390_v14 = vpop.f32.mrb[23].mxu0 }
 0x184   :  { %3693 = vst [vmem:[#allocation48_spill] sm:$0xff] %v2895_v8  ;;  %v492_v56 = vpop.permute.xlu1 %491 }
 0x185   :  { %3694 = vst [vmem:[#allocation49_spill] sm:$0xff] %v2898_v9  ;;  %v2900_v58 = vpop.eup %1825  ;;  %v553_v25 = vmul.f32 10.0, %v2898_v9  ;;  %v2904_v41 = vmul.f32 %v2841_v46, %v515_v16 }
 0x186   :  { %3695 = vst [vmem:[#allocation50_spill] sm:$0xff] %v2900_v58 }
 0x187   :  { %3696 = vst [vmem:[#allocation51_spill] sm:$0xff] %v2904_v41  ;;  %v579_v34 = vmul.f32 1.442695, %v553_v25  ;;  %v554_v40 = vmul.f32 10.0, %v2904_v41 }
 0x188   :  { %v393_v47 = vpop.f32.mrb[24].mxu0 }
 0x189   :  { %1831 = vpow2.f32 %v579_v34  ;;  %v581_v60 = vmul.f32 1.442695, %v554_v40  ;;  %v516_v48 = vmul.f32 %v487_v45, %v393_v47  ;;  %v395_v38 = vpop.f32.mrb[25].mxu0  ;;  %v497_v40 = vpop.permute.xlu0 %496 }
 0x18a   :  { %v396_v36 = vpop.f32.mrb[26].mxu0 }
 0x18b   :  { %v2907_v62 = vpop.eup %1827  ;;  %1833 = vpow2.f32 %v581_v60  ;;  %v2910_v7 = vmul.f32 %v2841_v46, %v516_v48  ;;  %v517_v14 = vmul.f32 %v492_v56, %v396_v36  ;;  %v398_v16 = vpop.f32.mrb[27].mxu0 }
 0x18c   :  { %3697 = vst [vmem:[#allocation52_spill] sm:$0xff] %v2907_v62  ;;  %v502_v48 = vpop.permute.xlu1 %501 }
 0x18d   :  { %3698 = vst [vmem:[#allocation53_spill] sm:$0xff] %v2910_v7  ;;  %v2912_v9 = vpop.eup %1829  ;;  %v555_v25 = vmul.f32 10.0, %v2910_v7  ;;  %v2916_v41 = vmul.f32 %v2841_v46, %v517_v14 }
 0x18e   :  { %3699 = vst [vmem:[#allocation54_spill] sm:$0xff] %v2912_v9 }
 0x18f   :  { %3700 = vst [vmem:[#allocation55_spill] sm:$0xff] %v2916_v41  ;;  %v583_v34 = vmul.f32 1.442695, %v555_v25  ;;  %v556_v38 = vmul.f32 10.0, %v2916_v41 }
 0x190   :  { %v401_v45 = vpop.f32.mrb[28].mxu0 }
 0x191   :  { %1835 = vpow2.f32 %v583_v34  ;;  %v585_v47 = vmul.f32 1.442695, %v556_v38  ;;  %v518_v60 = vmul.f32 %v497_v40, %v401_v45  ;;  %v403_v28 = vpop.f32.mrb[29].mxu0 }
 0x192   :  { %v404_v27 = vpop.f32.mrb[30].mxu0 }
 0x193   :  { %v2919_v36 = vpop.eup %1831  ;;  %1837 = vpow2.f32 %v585_v47  ;;  %v2922_v56 = vmul.f32 %v2841_v46, %v518_v60  ;;  %v519_v16 = vmul.f32 %v502_v48, %v404_v27  ;;  %v406_v14 = vpop.f32.mrb[31].mxu0  ;;  %v2941_v60 = vmov 1.0  }
 0x194   :  { %3701 = vst [vmem:[#allocation56_spill] sm:$0xff] %v2919_v36  ;;  %v2945_v48 = vmov 1.0   ;;  %v2949_v14 = vmov 1.0  }
 0x195   :  { %3702 = vst [vmem:[#allocation57_spill] sm:$0xff] %v2922_v56  ;;  %v2924_v7 = vpop.eup %1833  ;;  %v557_v25 = vmul.f32 10.0, %v2922_v56  ;;  %v2928_v41 = vmul.f32 %v2841_v46, %v519_v16  ;;  %v2943_v46 = vmov 1.0   ;;  %v2947_v16 = vmov 1.0  }
 0x196   :  { %3703 = vst [vmem:[#allocation58_spill] sm:$0xff] %v2924_v7  ;;  %v2961_v56 = vmov 1.0  }
 0x197   :  { %3704 = vst [vmem:[#allocation59_spill] sm:$0xff] %v2928_v41  ;;  %v587_v34 = vmul.f32 1.442695, %v557_v25  ;;  %v558_v28 = vmul.f32 10.0, %v2928_v41  ;;  %v2951_v25 = vmov 1.0   ;;  %v2959_v41 = vmov 1.0  }
 0x199   :  { %1839 = vpow2.f32 %v587_v34  ;;  %v589_v38 = vmul.f32 1.442695, %v558_v28  ;;  %v2953_v34 = vmov 1.0   ;;  %v2955_v28 = vmov 1.0  }
 0x19b   :  { %v2931_v40 = vpop.eup %1835  ;;  %1841 = vpow2.f32 %v589_v38  ;;  %v2957_v38 = vmov 1.0  }
 0x19c   :  { %3705 = vst [vmem:[#allocation60_spill] sm:$0xff] %v2931_v40 }
 0x19d   :  { %v2933_v45 = vpop.eup %1837 }
 0x19e   :  { %3706 = vst [vmem:[#allocation61_spill] sm:$0xff] %v2933_v45 }
 0x1a3   :  { %v2935_v47 = vpop.eup %1839 }
 0x1a5   :  { %v2937_v27 = vpop.eup %1841 }
 0x1a6 LB: > { %v3707_v45 = vld [vmem:[#allocation61_spill] sm:$0xff]  ;;  %v3708_v52 = vld [vmem:[#allocation36_spill] sm:$0xff]  ;;  %v3710_v24 = vld [vmem:[#allocation46_spill] sm:$0xff]  ;;  %p615_p0 = scmp.gt.f32.partialorder %s2128_s0, 1e-06  ;;  %s3035_s25 = smov 0   ;;  %v2180_v13 = vphi %v2965_v13, %v3754_v13   ;;  %v2176_v33 = vphi %v2963_v33, %v3753_v33   ;;  %v2172_v56 = vphi %v2961_v56, %v3752_v56   ;;  %v2168_v41 = vphi %v2959_v41, %v3751_v41   ;;  %v2164_v38 = vphi %v2957_v38, %v3750_v38   ;;  %v2160_v28 = vphi %v2955_v28, %v3749_v28   ;;  %v2156_v34 = vphi %v2953_v34, %v3748_v34   ;;  %v2152_v25 = vphi %v2951_v25, %v3747_v25   ;;  %v2148_v14 = vphi %v2949_v14, %v3746_v14   ;;  %v2144_v16 = vphi %v2947_v16, %v3745_v16   ;;  %v2140_v48 = vphi %v2945_v48, %v3744_v48   ;;  %v2136_v46 = vphi %v2943_v46, %v3743_v46   ;;  %v2132_v60 = vphi %v2941_v60, %v3742_v60   ;;  %s2128_s0 = sphi %s2939_s0, %s3741_s0   ;;  %s2200_s3 = sphi %s2975_s3, %s596_s3   ;;  %v2196_v10 = vphi %v2973_v10, %v3758_v10   ;;  %v2192_v11 = vphi %v2971_v11, %v3757_v11   ;;  %v2188_v20 = vphi %v2969_v20, %v3756_v20   ;;  %v2184_v22 = vphi %v2967_v22, %v3755_v22  }
 0x1a7   : > { %v3709_v26 = vld [vmem:[#allocation40_spill] sm:$0xff]  ;;  %v3713_v58 = vld [vmem:[#allocation50_spill] sm:$0xff]  ;;  %v3037_v43 = vmov 0   ;;  %v3039_v31 = vmov 0   ;;  %v3041_v3 = vmov 0   ;;  %v3043_v0 = vmov 0  }
 0x1a8   : > { %v3711_v8 = vld [vmem:[#allocation48_spill] sm:$0xff]  ;;  %v3715_v9 = vld [vmem:[#allocation54_spill] sm:$0xff]  ;;  %v3045_v59 = vmov 0   ;;  %v3047_v57 = vmov 0   ;;  %v3049_v6 = vmov 0   ;;  %v3051_v54 = vmov 0  }
 0x1a9   : > { %v3712_v40 = vld [vmem:[#allocation60_spill] sm:$0xff]  ;;  %v3717_v7 = vld [vmem:[#allocation58_spill] sm:$0xff]  ;;  %v3053_v50 = vmov 0   ;;  %v3055_v49 = vmov 0   ;;  %v3057_v44 = vmov 0   ;;  %v3059_v42 = vmov 0  }
 0x1aa   : > { %v3714_v62 = vld [vmem:[#allocation52_spill] sm:$0xff]  ;;  %v3719_v39 = vld [vmem:[#allocation42_spill] sm:$0xff]  ;;  %v3061_v29 = vmov 0   ;;  %v3063_v23 = vmov 0   ;;  %v3065_v32 = vmov 0   ;;  %v3067_v30 = vmov 0  }
 0x1ab   : > { %v3716_v36 = vld [vmem:[#allocation56_spill] sm:$0xff]  ;;  %v3720_v61 = vld [vmem:[#allocation38_spill] sm:$0xff]  ;;  %v3069_v18 = vmov 0   ;;  %618 = sbr.rel (!%p615_p0) target bundleno = 725 (0x2d5), region = 32  ;;  %v621_v15 = vmul.f32 (%p615_p0), %v2132_v60, %v3709_v26  ;;  %v619_v63 = vmul.f32 (%p615_p0), %v2132_v60, %v3708_v52  ;;  %v622_v55 = vmul.f32 (%p615_p0), %v2132_v60, %v3719_v39 }
 0x1ac   : > { %v3718_v12 = vld [vmem:[#allocation44_spill] sm:$0xff]  ;;  %v620_v5 = vmul.f32 (%p615_p0), %v2132_v60, %v3720_v61  ;;  %v624_v1 = vmul.f32 (%p615_p0), %v2132_v60, %v3710_v24  ;;  %v625_v30 = vmul.f32 (%p615_p0), %v2132_v60, %v3711_v8  ;;  %v628_v32 = vmul.f32 (%p615_p0), %v2132_v60, %v3715_v9 }
 0x1ad   : > { %639 = vadd.xlane.f32.xlu1 (%p615_p0), %v621_v15  ;;  %635 = vadd.xlane.f32.xlu0 (%p615_p0), %v619_v63  ;;  %v623_v18 = vmul.f32 (%p615_p0), %v2132_v60, %v3718_v12  ;;  %v626_v15 = vmul.f32 (%p615_p0), %v2132_v60, %v3713_v58  ;;  %v629_v42 = vmul.f32 (%p615_p0), %v2132_v60, %v3716_v36 }
 0x1ae   : > { %v632_v44 = vmul.f32 (%p615_p0), %v2132_v60, %v3707_v45  ;;  %v631_v49 = vmul.f32 (%p615_p0), %v2132_v60, %v3712_v40  ;;  %v634_v50 = vmul.f32 (%p615_p0), %v2132_v60, %v2937_v27  ;;  %v633_v57 = vmul.f32 (%p615_p0), %v2132_v60, %v2935_v47 }
 0x1b1   : > { %641 = vadd.xlane.f32.xlu1 (%p615_p0), %v622_v55  ;;  %637 = vadd.xlane.f32.xlu0 (%p615_p0), %v620_v5  ;;  %v627_v5 = vmul.f32 (%p615_p0), %v2132_v60, %v3714_v62 }
 0x1b5   : > { %645 = vadd.xlane.f32.xlu1 %v624_v1  ;;  %643 = vadd.xlane.f32.xlu0 %v623_v18  ;;  %v630_v1 = vmul.f32 %v2132_v60, %v3717_v7 }
 0x1b9   : > { %649 = vadd.xlane.f32.xlu1 %v626_v15  ;;  %647 = vadd.xlane.f32.xlu0 %v625_v30 }
 0x1bd   : > { %653 = vadd.xlane.f32.xlu1 %v628_v32  ;;  %651 = vadd.xlane.f32.xlu0 %v627_v5 }
 0x1c1   : > { %657 = vadd.xlane.f32.xlu1 %v630_v1  ;;  %655 = vadd.xlane.f32.xlu0 %v629_v42 }
 0x1c5   : > { %661 = vadd.xlane.f32.xlu1 %v632_v44  ;;  %659 = vadd.xlane.f32.xlu0 %v631_v49 }
 0x1c9   : > { %665 = vadd.xlane.f32.xlu1 %v634_v50  ;;  %663 = vadd.xlane.f32.xlu0 %v633_v57 }
 0x23a   : > { %v640_v59 = vpop.xlane.xlu1 %639  ;;  %v636_v0 = vpop.xlane.xlu0 %635 }
 0x23b   : > { %v669_v3 = vmax.f32 %v640_v59, 1e-30  ;;  %v667_v55 = vmax.f32 %v636_v0, 1e-30 }
 0x23d   : > { %1843 = vrcp.f32 %v669_v3 }
 0x23e   : > { %1845 = vrcp.f32 %v667_v55  ;;  %v642_v63 = vpop.xlane.xlu1 %641  ;;  %v638_v23 = vpop.xlane.xlu0 %637 }
 0x23f   : > { %v670_v29 = vmax.f32 %v642_v63, 1e-30  ;;  %v668_v54 = vmax.f32 %v638_v23, 1e-30 }
 0x241   : > { %1847 = vrcp.f32 %v670_v29 }
 0x242   : > { %1849 = vrcp.f32 %v668_v54  ;;  %v646_v6 = vpop.xlane.xlu1 %645  ;;  %v644_v31 = vpop.xlane.xlu0 %643 }
 0x243   : > { %v672_v43 = vmax.f32 %v646_v6, 1e-30  ;;  %v671_v18 = vmax.f32 %v644_v31, 1e-30 }
 0x245   : > { %1851 = vrcp.f32 %v672_v43 }
 0x246   : > { %1853 = vrcp.f32 %v671_v18  ;;  %v650_v15 = vpop.xlane.xlu1 %649  ;;  %v648_v30 = vpop.xlane.xlu0 %647 }
 0x247   : > { %v1844_v32 = vpop.eup %1843  ;;  %v674_v5 = vmax.f32 %v650_v15, 1e-30  ;;  %v673_v44 = vmax.f32 %v648_v30, 1e-30 }
 0x248   : > { %v1846_v1 = vpop.eup %1845  ;;  %v688_v42 = vmul.f32 0.0078125, %v1844_v32 }
 0x249   : > { %v684_v49 = vmul.f32 0.0078125, %v1846_v1  ;;  %1855 = vrcp.f32 %v674_v5 }
 0x24a   : > { %1857 = vlog2.f32 %v688_v42  ;;  %v654_v50 = vpop.xlane.xlu1 %653  ;;  %v652_v57 = vpop.xlane.xlu0 %651 }
 0x24b   : > { %v1848_v59 = vpop.eup %1847  ;;  %1859 = vlog2.f32 %v684_v49  ;;  %v676_v0 = vmax.f32 %v654_v50, 1e-30  ;;  %v675_v63 = vmax.f32 %v652_v57, 1e-30 }
 0x24c   : > { %v1850_v3 = vpop.eup %1849  ;;  %v690_v55 = vmul.f32 0.0078125, %v1848_v59  ;;  %1861 = vrcp.f32 %v673_v44 }
 0x24d   : > { %v686_v23 = vmul.f32 0.0078125, %v1850_v3  ;;  %1863 = vrcp.f32 %v676_v0 }
 0x24e   : > { %1865 = vlog2.f32 %v690_v55  ;;  %v658_v29 = vpop.xlane.xlu1 %657  ;;  %v656_v54 = vpop.xlane.xlu0 %655 }
 0x24f   : > { %v1852_v6 = vpop.eup %1851  ;;  %1867 = vlog2.f32 %v686_v23  ;;  %v678_v31 = vmax.f32 %v658_v29, 1e-30  ;;  %v677_v15 = vmax.f32 %v656_v54, 1e-30 }
 0x250   : > { %v1854_v43 = vpop.eup %1853  ;;  %v694_v18 = vmul.f32 0.0078125, %v1852_v6  ;;  %1869 = vrcp.f32 %v675_v63 }
 0x251   : > { %v692_v30 = vmul.f32 0.0078125, %v1854_v43  ;;  %1871 = vrcp.f32 %v678_v31 }
 0x252   : > { %1873 = vlog2.f32 %v694_v18  ;;  %v662_v32 = vpop.xlane.xlu1 %661  ;;  %v660_v5 = vpop.xlane.xlu0 %659 }
 0x253   : > { %v1856_v1 = vpop.eup %1855  ;;  %1875 = vlog2.f32 %v692_v30  ;;  %v680_v42 = vmax.f32 %v662_v32, 1e-30  ;;  %v679_v44 = vmax.f32 %v660_v5, 1e-30 }
 0x254   : > { %v1858_v49 = vpop.eup %1857  ;;  %v698_v50 = vmul.f32 0.0078125, %v1856_v1  ;;  %1877 = vrcp.f32 %v677_v15 }
 0x255   : > { %v1860_v57 = vpop.eup %1859  ;;  %v720_v59 = vmul.f32 0.6931472, %v1858_v49  ;;  %1879 = vrcp.f32 %v680_v42 }
 0x256   : > { %v1862_v0 = vpop.eup %1861  ;;  %v716_v3 = vmul.f32 0.6931472, %v1860_v57  ;;  %1881 = vlog2.f32 %v698_v50 }
 0x257   : > { %v1864_v55 = vpop.eup %1863  ;;  %v749_v63 = vmul.f32 0.00990099, %v720_v59  ;;  %v696_v23 = vmul.f32 0.0078125, %v1862_v0  ;;  %1883 = vrcp.f32 %v679_v44 }
 0x258   : > { %v1866_v29 = vpop.eup %1865  ;;  %v747_v54 = vmul.f32 0.00990099, %v716_v3  ;;  %v702_v6 = vmul.f32 0.0078125, %v1864_v55 }
 0x259   : > { %v1868_v31 = vpop.eup %1867  ;;  %v767_v43 = vmul.f32 1.442695, %v749_v63  ;;  %v722_v18 = vmul.f32 0.6931472, %v1866_v29  ;;  %1885 = vlog2.f32 %v696_v23 }
 0x25a   : > { %v1870_v30 = vpop.eup %1869  ;;  %v763_v32 = vmul.f32 1.442695, %v747_v54  ;;  %v718_v15 = vmul.f32 0.6931472, %v1868_v31  ;;  %1887 = vlog2.f32 %v702_v6  ;;  %v666_v6 = vpop.xlane.xlu1 %665 }
 0x25b   : > { %v1872_v5 = vpop.eup %1871  ;;  %1889 = vpow2.f32 %v767_v43  ;;  %v750_v1 = vmul.f32 0.00990099, %v722_v18  ;;  %v700_v42 = vmul.f32 0.0078125, %v1870_v30 }
 0x25c   : > { %v1874_v49 = vpop.eup %1873  ;;  %1891 = vpow2.f32 %v763_v32  ;;  %v748_v50 = vmul.f32 0.00990099, %v718_v15  ;;  %v706_v57 = vmul.f32 0.0078125, %v1872_v5 }
 0x25d   : > { %v1876_v44 = vpop.eup %1875  ;;  %v769_v59 = vmul.f32 1.442695, %v750_v1  ;;  %v726_v0 = vmul.f32 0.6931472, %v1874_v49  ;;  %1893 = vlog2.f32 %v700_v42  ;;  %v682_v42 = vmax.f32 %v666_v6, 1e-30  ;;  %v664_v49 = vpop.xlane.xlu0 %663 }
 0x25e   : > { %v1878_v3 = vpop.eup %1877  ;;  %v765_v55 = vmul.f32 1.442695, %v748_v50  ;;  %v724_v63 = vmul.f32 0.6931472, %v1876_v44  ;;  %1895 = vlog2.f32 %v706_v57 }
 0x25f   : > { %v1880_v23 = vpop.eup %1879  ;;  %1897 = vpow2.f32 %v769_v59  ;;  %v752_v29 = vmul.f32 0.00990099, %v726_v0  ;;  %v704_v54 = vmul.f32 0.0078125, %v1878_v3 }
 0x260   : > { %v1882_v31 = vpop.eup %1881  ;;  %1899 = vpow2.f32 %v765_v55  ;;  %v751_v43 = vmul.f32 0.00990099, %v724_v63  ;;  %v710_v18 = vmul.f32 0.0078125, %v1880_v23  ;;  %v681_v55 = vmax.f32 %v664_v49, 1e-30 }
 0x261   : > { %v1884_v30 = vpop.eup %1883  ;;  %v773_v32 = vmul.f32 1.442695, %v752_v29  ;;  %v730_v15 = vmul.f32 0.6931472, %v1882_v31  ;;  %1901 = vlog2.f32 %v704_v54 }
 0x262   : > { %v771_v5 = vmul.f32 1.442695, %v751_v43  ;;  %1903 = vlog2.f32 %v710_v18  ;;  %v708_v1 = vmul.f32 0.0078125, %v1884_v30 }
 0x263   : > { %v1886_v50 = vpop.eup %1885  ;;  %1905 = vpow2.f32 %v773_v32  ;;  %v754_v57 = vmul.f32 0.00990099, %v730_v15 }
 0x264   : > { %v1888_v44 = vpop.eup %1887  ;;  %1907 = vpow2.f32 %v771_v5  ;;  %v728_v59 = vmul.f32 0.6931472, %v1886_v50 }
 0x265   : > { %v3105_v32 = vpop.eup %1889   ;;  %v777_v0 = vmul.f32 1.442695, %v754_v57  ;;  %v734_v3 = vmul.f32 0.6931472, %v1888_v44  ;;  %1909 = vlog2.f32 %v708_v1 }
 0x266   : > { %v3107_v18 = vpop.eup %1891   ;;  %v753_v63 = vmul.f32 0.00990099, %v728_v59  ;;  %1911 = vrcp.f32 %v682_v42 }
 0x267   : > { %v1894_v23 = vpop.eup %1893  ;;  %1913 = vpow2.f32 %v777_v0  ;;  %v756_v6 = vmul.f32 0.00990099, %v734_v3  ;;  %v795_v15 = vmul.f32 %v3107_v18, %v3708_v52  ;;  %v797_v0 = vmul.f32 %v3105_v32, %v3709_v26 }
 0x268   : > { %v1896_v29 = vpop.eup %1895  ;;  %v775_v54 = vmul.f32 1.442695, %v753_v63  ;;  %v732_v31 = vmul.f32 0.6931472, %v1894_v23  ;;  %1915 = vrcp.f32 %v681_v55 }
 0x269   : > { %v3109_v23 = vpop.eup %1897   ;;  %v738_v43 = vmul.f32 0.6931472, %v1896_v29  ;;  %v781_v5 = vmul.f32 1.442695, %v756_v6 }
 0x26a   : > { %v3111_v30 = vpop.eup %1899   ;;  %1917 = vpow2.f32 %v775_v54  ;;  %v755_v49 = vmul.f32 0.00990099, %v732_v31  ;;  %v798_v54 = vmul.f32 %v3109_v23, %v3719_v39 }
 0x26b   : > { %v1902_v1 = vpop.eup %1901  ;;  %v796_v42 = vmul.f32 %v3111_v30, %v3720_v61  ;;  %1919 = vpow2.f32 %v781_v5  ;;  %v758_v57 = vmul.f32 0.00990099, %v738_v43 }
 0x26c   : > { %v1904_v50 = vpop.eup %1903  ;;  %v736_v44 = vmul.f32 0.6931472, %v1902_v1  ;;  %v779_v55 = vmul.f32 1.442695, %v755_v49 }
 0x26d   : > { %v3117_v59 = vpop.eup %1905   ;;  %v811_v3 = vadd.f32 %v796_v42, %v795_v15  ;;  %v742_v29 = vmul.f32 0.6931472, %v1904_v50  ;;  %v785_v6 = vmul.f32 1.442695, %v758_v57 }
 0x26e   : > { %v3721_v63 = vmov %v3117_v59  ;;  %v3121_v53 = vpop.eup %1907   ;;  %v757_v51 = vmul.f32 0.00990099, %v736_v44  ;;  %1921 = vpow2.f32 %v779_v55 }
 0x26f   : > { %v1910_v31 = vpop.eup %1909  ;;  %v812_v61 = vadd.f32 %v811_v3, %v797_v0  ;;  %v799_v43 = vmul.f32 %v3121_v53, %v3718_v12  ;;  %v760_v59 = vmul.f32 0.00990099, %v742_v29  ;;  %1923 = vpow2.f32 %v785_v6 }
 0x270   : > { %v1912_v5 = vpop.eup %1911  ;;  %v783_v1 = vmul.f32 1.442695, %v757_v51  ;;  %v740_v42 = vmul.f32 0.6931472, %v1910_v31  ;;  %v800_v39 = vmul.f32 %v3721_v63, %v3710_v24 }
 0x271   : > { %v3127_v49 = vpop.eup %1913   ;;  %v813_v15 = vadd.f32 %v812_v61, %v798_v54  ;;  %v714_v50 = vmul.f32 0.0078125, %v1912_v5  ;;  %v789_v57 = vmul.f32 1.442695, %v760_v59 }
 0x272   : > { %1925 = vpow2.f32 %v783_v1  ;;  %v1916_v44 = vpop.eup %1915  ;;  %v759_v3 = vmul.f32 0.00990099, %v740_v42  ;;  %v802_v6 = vmul.f32 %v3127_v49, %v3713_v58 }
 0x273   : > { %v814_v0 = vadd.f32 %v813_v15, %v799_v43  ;;  %1927 = vlog2.f32 %v714_v50  ;;  %v712_v51 = vmul.f32 0.0078125, %v1916_v44 }
 0x274   : > { %v3131_v12 = vpop.eup %1917   ;;  %1929 = vpow2.f32 %v789_v57  ;;  %v787_v29 = vmul.f32 1.442695, %v759_v3 }
 0x275   : > { %v815_v55 = vadd.f32 %v814_v0, %v800_v39  ;;  %v801_v61 = vmul.f32 %v3131_v12, %v3711_v8  ;;  %v3135_v54 = vpop.eup %1919   ;;  %1931 = vlog2.f32 %v712_v51 }
 0x276   : > { %1933 = vpow2.f32 %v787_v29  ;;  %v804_v59 = vmul.f32 %v3135_v54, %v3715_v9 }
 0x277   : > { %v816_v31 = vadd.f32 %v815_v55, %v801_v61 }
 0x278   : > { %v3139_v50 = vpop.eup %1921  }
 0x279   : > { %v817_v43 = vadd.f32 %v816_v31, %v802_v6  ;;  %v3141_v57 = vpop.eup %1923   ;;  %v803_v39 = vmul.f32 %v3139_v50, %v3714_v62 }
 0x27b   : > { %v818_v1 = vadd.f32 %v817_v43, %v803_v39  ;;  %v844_v39 = vsub.f32 %v3121_v53, %v2180_v13 }
 0x27c   : > { %v3145_v6 = vpop.eup %1925  }
 0x27d   : > { %v1928_v5 = vpop.eup %1927  ;;  %v819_v44 = vadd.f32 %v818_v1, %v804_v59  ;;  %v805_v55 = vmul.f32 %v3145_v6, %v3716_v36  ;;  %v840_v1 = vsub.f32 %v3107_v18, %v2196_v10 }
 0x27e   : > { %v3147_v0 = vpop.eup %1929   ;;  %v746_v15 = vmul.f32 0.6931472, %v1928_v5  ;;  %v806_v5 = vmul.f32 %v3141_v57, %v3717_v7  ;;  %v851_v7 = vsub.f32 %v3141_v57, %v2152_v25 }
 0x27f   : > { %v1932_v42 = vpop.eup %1931  ;;  %v820_v31 = vadd.f32 %v819_v44, %v805_v55  ;;  %v842_v44 = vsub.f32 %v3105_v32, %v2188_v20  ;;  %v847_v55 = vsub.f32 %v3127_v49, %v2168_v41  ;;  %v853_v36 = vsub.f32 %v3147_v0, %v2144_v16 }
 0x280   : > { %v762_v3 = vmul.f32 0.00990099, %v746_v15  ;;  %v3151_v59 = vpop.eup %1933   ;;  %v744_v51 = vmul.f32 0.6931472, %v1932_v42  ;;  %v841_v15 = vsub.f32 %v3111_v30, %v2192_v11  ;;  %v845_v42 = vsub.f32 %v3721_v63, %v2176_v33 }
 0x281   : > { %v852_v9 = vsub.f32 %v3151_v59, %v2148_v14  ;;  %v808_v58 = vmul.f32 %v3147_v0, %v3707_v45  ;;  %2117 = vmaxabs.init.f32.vacc1 %v844_v39, %v840_v1 }
 0x282   : > { %v793_v61 = vmul.f32 1.442695, %v762_v3  ;;  %v761_v29 = vmul.f32 0.00990099, %v744_v51  ;;  %v821_v3 = vadd.f32 %v820_v31, %v806_v5  ;;  %v843_v51 = vsub.f32 %v3109_v23, %v2184_v22 }
 0x283   : > { %v807_v31 = vmul.f32 %v3151_v59, %v3712_v40  ;;  %v850_v5 = vsub.f32 %v3145_v6, %v2156_v34  ;;  %2118 = vmaxabs.f32.vacc1 %v841_v15, %v845_v42 }
 0x284   : > { %1935 = vpow2.f32 %v793_v61  ;;  %v791_v43 = vmul.f32 1.442695, %v761_v29  ;;  %v846_v61 = vsub.f32 %v3131_v12, %v2172_v56  ;;  %v848_v29 = vsub.f32 %v3139_v50, %v2164_v38 }
 0x285   : > { %v822_v62 = vadd.f32 %v821_v3, %v807_v31  ;;  %2119 = vmaxabs.f32.vacc1 %v843_v51, %v847_v55 }
 0x286   : > { %1937 = vpow2.f32 %v791_v43  ;;  %v849_v43 = vsub.f32 %v3135_v54, %v2160_v28 }
 0x287   : > { %v823_v8 = vadd.f32 %v822_v62, %v808_v58  ;;  %2120 = vmaxabs.f32.vacc1 %v842_v44, %v846_v61 }
 0x289   : > { %2121 = vmaxabs.f32.vacc1 %v848_v29, %v849_v43 }
 0x28b   : > { %2122 = vmaxabs.f32.vacc1 %v851_v7, %v850_v5 }
 0x28d   : > { %2123 = vmaxabs.f32.vacc1 %v852_v9, %v853_v36 }
 0x28e   : > { %v1936_v31 = vpop.eup %1935  }
 0x28f   : > { %v855_v40 = vsub.f32 %v1936_v31, %v2136_v46  ;;  %v810_v52 = vmul.f32 %v1936_v31, %v2937_v27 }
 0x290   : > { %v1938_v3 = vpop.eup %1937  }
 0x291   : > { %v809_v24 = vmul.f32 %v1938_v3, %v2935_v47  ;;  %v854_v26 = vsub.f32 %v1938_v3, %v2140_v48 }
 0x293   : > { %v824_v37 = vadd.f32 %v823_v8, %v809_v24  ;;  %2124 = vmaxabs.f32.vacc1 %v855_v40, %v854_v26 }
 0x295   : > { %v825_v45 = vadd.f32 %v824_v37, %v810_v52  ;;  %v2125_v35 = vmovacc.low.even.vacc1 }
 0x297   : > { %v826_v39 = vrot.slane %v825_v45, 4  ;;  %v887_v58 = vrot.slane %v2125_v35, 4 }
 0x299   : > { %v827_v1 = vadd.f32 %v826_v39, %v825_v45  ;;  %v888_v42 = vmax.f32 %v2125_v35, %v887_v58 }
 0x29b   : > { %v828_v15 = vrot.slane %v827_v1, 2  ;;  %v889_v51 = vrot.slane %v888_v42, 2 }
 0x29d   : > { %v829_v62 = vadd.f32 %v828_v15, %v827_v1  ;;  %v890_v61 = vmax.f32 %v888_v42, %v889_v51  ;;  %v3723_v42 = vmov %v3721_v63 }
 0x29f   : > { %v830_v44 = vrot.slane %v829_v62, 1  ;;  %v891_v43 = vrot.slane %v890_v61, 1 }
 0x2a1   : > { %v831_v55 = vadd.f32 %v830_v44, %v829_v62  ;;  %v892_v9 = vmax.f32 %v890_v61, %v891_v43  ;;  %v3722_v44 = vmov %v3131_v12 }
 0x2a3   : > { %v832_v29 = vmax.f32 %v831_v55, 1e-30  ;;  %1419 = vpush %v892_v9 }
 0x2a5   : > { %1939 = vrcp.f32 %v832_v29  ;;  %v3724_v29 = vmov %v3121_v53 }
 0x2af   : > { %v1940_v7 = vpop.eup %1939 }
 0x2b0   : > { %v834_v24 = vmul.f32 0.0078125, %v1940_v7 }
 0x2b2   : > { %1941 = vlog2.f32 %v834_v24 }
 0x2bc   : > { %v1942_v37 = vpop.eup %1941 }
 0x2bd   : > { %v836_v52 = vmul.f32 0.6931472, %v1942_v37 }
 0x2bf   : > { %v837_v26 = vmul.f32 0.00990099, %v836_v52 }
 0x2c1   : > { %v838_v8 = vmul.f32 1.442695, %v837_v26 }
 0x2c3   : > { %1943 = vpow2.f32 %v838_v8 }
 0x2cd   : > { %v1944_v43 = vpop.eup %1943  }
 0x2d4   : > { %s1420_s25 = spop %1419  }
 0x2d5 PF: > { %s1491_s26 = scalar_select %p615_p0, 0, 1  ;;  %v2272_v18 = vphi %v3069_v18, %v3107_v18   ;;  %v2268_v30 = vphi %v3067_v30, %v3111_v30   ;;  %v2264_v32 = vphi %v3065_v32, %v3105_v32   ;;  %v2260_v23 = vphi %v3063_v23, %v3109_v23   ;;  %v2256_v29 = vphi %v3061_v29, %v3724_v29   ;;  %v2252_v42 = vphi %v3059_v42, %v3723_v42   ;;  %v2248_v44 = vphi %v3057_v44, %v3722_v44   ;;  %v2244_v49 = vphi %v3055_v49, %v3127_v49   ;;  %v2240_v50 = vphi %v3053_v50, %v3139_v50   ;;  %v2236_v54 = vphi %v3051_v54, %v3135_v54   ;;  %v2232_v6 = vphi %v3049_v6, %v3145_v6   ;;  %v2228_v57 = vphi %v3047_v57, %v3141_v57   ;;  %v2224_v59 = vphi %v3045_v59, %v3151_v59   ;;  %v2220_v0 = vphi %v3043_v0, %v3147_v0   ;;  %v2216_v3 = vphi %v3041_v3, %v1938_v3   ;;  %v2212_v31 = vphi %v3039_v31, %v1936_v31   ;;  %v2208_v43 = vphi %v3037_v43, %v1944_v43   ;;  %s2204_s25 = sphi %s3035_s25, %s1420_s25  }
 0x2d6   : > { %s3818_s25 = smov (!%p615_p0, %s2204_s25), %s2128_s0  ;;  %s596_s3 = sadd.s32 1, %s2200_s3  }
 0x2d7   : > { %v1423_v35 = vstv %s1491_s26  ;;  %p3348_p1 = scmp.ge.s32.totalorder %s596_s3, 100   ;;  %s3741_s0 = smov %s3818_s25 }
 0x2d8   : > { %vm3266_vm0 = vcmp.ne.s32.totalorder %v1423_v35, 0  ;;  %1021 = vmatprep.subr.bf16.mxu1 (%p3348_p1), %v2344_v17  ;;  %v3763_v15 = vld [vmem:[#allocation38_spill] sm:$0xff] (%p3348_p1)  ;;  %v3765_v17 = vld [vmem:[#allocation8_spill] sm:$0xff] (%p3348_p1)  ;;  %v3778_v9 = vld [vmem:[#allocation35_spill] sm:$0xff] (%p3348_p1) }
 0x2d9   : > { %v1425_v12 = vsel %vm3266_vm0, %v2196_v10, %v2272_v18   ;;  %v1429_v36 = vsel %vm3266_vm0, %v2192_v11, %v2268_v30   ;;  %v1433_v40 = vsel %vm3266_vm0, %v2188_v20, %v2264_v32   ;;  %v1437_v45 = vsel %vm3266_vm0, %v2184_v22, %v2260_v23   ;;  %1022 = vmatpush1.bf16.msra.mxu1 (%p3348_p1), %v2454_v2  ;;  %v3776_v51 = vld [vmem:[#allocation44_spill] sm:$0xff] (%p3348_p1)  ;;  %v3779_v24 = vld [vmem:[#allocation46_spill] sm:$0xff] (%p3348_p1)  ;;  %v3780_v52 = vld [vmem:[#allocation15_spill] sm:$0xff] (%p3348_p1) }
 0x2da   : > { %v3285_v13 = vsel %vm3266_vm0, %v2180_v13, %v2256_v29   ;;  %v3290_v33 = vsel %vm3266_vm0, %v2176_v33, %v2252_v42   ;;  %v3295_v56 = vsel %vm3266_vm0, %v2172_v56, %v2248_v44   ;;  %v3300_v41 = vsel %vm3266_vm0, %v2168_v41, %v2244_v49   ;;  %1023 = vmatprep.subr.bf16.mxu1 (%p3348_p1), %v2456_v4  ;;  %v3774_v42 = vld [vmem:[#allocation13_spill] sm:$0xff] (%p3348_p1)  ;;  %v3775_v44 = vld [vmem:[#allocation14_spill] sm:$0xff] (%p3348_p1)  ;;  %v983_v26 = vld [vmem:[%s3589_s4 + $0x10] sm:$0xff] (%p3348_p1) }
 0x2db   : > { %v3727_v63 = vmov %v3285_v13  ;;  %v3728_v18 = vmov %v3290_v33  ;;  %v3729_v30 = vmov %v3295_v56  ;;  %v3730_v32 = vmov %v3300_v41  ;;  %v3777_v29 = vld [vmem:[#allocation34_spill] sm:$0xff] (%p3348_p1)  ;;  %v984_v8 = vld [vmem:[%s3589_s4 + $0x18] sm:$0xff] (%p3348_p1) }
 0x2dc   : > { %v3305_v38 = vsel %vm3266_vm0, %v2164_v38, %v2240_v50   ;;  %v3310_v28 = vsel %vm3266_vm0, %v2160_v28, %v2236_v54   ;;  %v3315_v34 = vsel %vm3266_vm0, %v2156_v34, %v2232_v6   ;;  %v3320_v25 = vsel %vm3266_vm0, %v2152_v25, %v2228_v57   ;;  %v3781_v35 = vld [vmem:[#allocation16_spill] sm:$0xff] (%p3348_p1) }
 0x2dd   : > { %v3731_v23 = vmov %v3305_v38  ;;  %v3732_v5 = vmov %v3310_v28  ;;  %v3733_v39 = vmov %v3315_v34  ;;  %v3734_v49 = vmov %v3320_v25  ;;  %1024 = vmatpush1.bf16.msra.mxu1 (%p3348_p1), %v2496_v19  ;;  %v3767_v19 = vld [vmem:[#allocation10_spill] sm:$0xff] (%p3348_p1) }
 0x2de   : > { %v3325_v14 = vsel %vm3266_vm0, %v2148_v14, %v2224_v59   ;;  %v3330_v16 = vsel %vm3266_vm0, %v2144_v16, %v2220_v0   ;;  %v3335_v48 = vsel %vm3266_vm0, %v2140_v48, %v2216_v3   ;;  %v3340_v46 = vsel %vm3266_vm0, %v2136_v46, %v2212_v31   ;;  %595 = sbr.rel (!%p3348_p1) target bundleno = 422 (0x1a6), region = 55  ;;  %1025 = vmatprep.subr.bf16.mxu1 (%p3348_p1), %v2498_v21  ;;  %v3760_v0 = vld [vmem:[#allocation5_spill] sm:$0xff] (%p3348_p1)  ;;  %v3761_v3 = vld [vmem:[#allocation6_spill] sm:$0xff] (%p3348_p1)  ;;  %v3762_v31 = vld [vmem:[#allocation36_spill] sm:$0xff] (%p3348_p1) }
 0x2df   : > { %v3735_v50 = vmov %v3325_v14  ;;  %v3736_v54 = vmov %v3330_v16  ;;  %v3737_v6 = vmov %v3335_v48  ;;  %v3738_v57 = vmov %v3340_v46  ;;  %v3768_v21 = vld [vmem:[#allocation32_spill] sm:$0xff] (%p3348_p1) }
 0x2e0   : > { %v3345_v60 = vsel %vm3266_vm0, %v2132_v60, %v2208_v43   ;;  %v3743_v46 = vmov %v3738_v57  ;;  %v3744_v48 = vmov %v3737_v6  ;;  %v3745_v16 = vmov %v3736_v54 }
 0x2e1   : > { %v3739_v59 = vmov %v3345_v60  ;;  %v3746_v14 = vmov %v3735_v50  ;;  %v3747_v25 = vmov %v3734_v49  ;;  %v3748_v34 = vmov %v3733_v39  ;;  %1026 = vmatpush1.bf16.msra.mxu1 (%p3348_p1), %v3760_v0  ;;  %v3772_v48 = vld [vmem:[#allocation11_spill] sm:$0xff] (%p3348_p1)  ;;  %v981_v16 = vld [vmem:[%s3589_s4] sm:$0xff] (%p3348_p1) }
 0x2e2   : > { %v3742_v60 = vmov %v3739_v59  ;;  %v3749_v28 = vmov %v3732_v5  ;;  %v3750_v38 = vmov %v3731_v23  ;;  %v3751_v41 = vmov %v3730_v32  ;;  %1027 = vmatprep.subr.bf16.mxu1 (%p3348_p1), %v3761_v3  ;;  %v982_v14 = vld [vmem:[%s3589_s4 + $0x8] sm:$0xff] (%p3348_p1)  ;;  %v3773_v25 = vld [vmem:[#allocation12_spill] sm:$0xff] (%p3348_p1) }
 0x2e3   : > { %v3752_v56 = vmov %v3729_v30  ;;  %v3753_v33 = vmov %v3728_v18  ;;  %v3754_v13 = vmov %v3727_v63  ;;  %v3755_v22 = vmov %v1437_v45  ;;  %v3769_v41 = vld [vmem:[#allocation33_spill] sm:$0xff] (%p3348_p1)  ;;  %v3771_v60 = vld [vmem:[#allocation42_spill] sm:$0xff] (%p3348_p1) }
 0x2e4   : > { %v3756_v20 = vmov %v1433_v40  ;;  %v3757_v11 = vmov %v1429_v36  ;;  %v3758_v10 = vmov %v1425_v12  ;;  %v933_v1 = vmul.f32 (%p3348_p1), %v3762_v31, %v1425_v12  ;;  %v3770_v33 = vld [vmem:[#allocation40_spill] sm:$0xff] (%p3348_p1)  ;;  %v3785_v31 = vld [vmem:[#allocation37_spill] sm:$0xff] (%p3348_p1) }
 0x2e5   :  { %v3759_v10 = vmov 0   ;;  %v934_v58 = vmul.f32 %v3763_v15, %v1429_v36  ;;  %v3764_v11 = vld [vmem:[#allocation7_spill] sm:$0xff]  ;;  %v3766_v20 = vld [vmem:[#allocation9_spill] sm:$0xff]  ;;  %v935_v56 = vmul.f32 %v3770_v33, %v1433_v40  ;;  %v936_v46 = vmul.f32 %v3771_v60, %v1437_v45 }
 0x2e6   :  { %1053 = vmatprep.mubr.bf16.mxu1 %v3759_v10  ;;  %1028 = vmatpush1.bf16.msra.mxu1 %v3764_v11  ;;  %v949_v2 = vmul.f32 %v3739_v59, %v933_v1  ;;  %v937_v55 = vmul.f32 %v3776_v51, %v3727_v63  ;;  %v938_v37 = vmul.f32 %v3779_v24, %v3728_v18  ;;  %v3782_v45 = vld [vmem:[#allocation17_spill] sm:$0xff]  ;;  %v3783_v63 = vld [vmem:[#allocation18_spill] sm:$0xff]  ;;  %v3784_v18 = vld [vmem:[#allocation48_spill] sm:$0xff] }
 0x2e7   :  { %1029 = vmatprep.subr.bf16.mxu1 %v3765_v17  ;;  %v950_v4 = vmul.f32 %v3739_v59, %v934_v58  ;;  %v951_v38 = vmul.f32 %v3739_v59, %v935_v56  ;;  %v952_v62 = vmul.f32 %v3739_v59, %v936_v46  ;;  %v939_v0 = vmul.f32 %v3784_v18, %v3729_v30  ;;  %v3786_v15 = vld [vmem:[#allocation39_spill] sm:$0xff]  ;;  %v3787_v11 = vld [vmem:[#allocation50_spill] sm:$0xff]  ;;  %v3789_v30 = vld [vmem:[#allocation20_spill] sm:$0xff] }
 0x2e8   :  { %v965_v22 = vmul.f32 %v949_v2, %v3768_v21  ;;  %v953_v36 = vmul.f32 %v3739_v59, %v937_v55  ;;  %v954_v40 = vmul.f32 %v3739_v59, %v938_v37  ;;  %v940_v17 = vmul.f32 %v3787_v11, %v3730_v32  ;;  %v3788_v2 = vld [vmem:[#allocation19_spill] sm:$0xff]  ;;  %v3792_v33 = vld [vmem:[#allocation41_spill] sm:$0xff] }
 0x2e9   :  { %v966_v13 = vmul.f32 %v950_v4, %v3769_v41  ;;  %v967_v43 = vmul.f32 %v951_v38, %v3777_v29  ;;  %v968_v7 = vmul.f32 %v952_v62, %v3778_v9  ;;  %v985_v4 = vld [vmem:[%s3589_s4 + $0x20] sm:$0xff]  ;;  %v3793_v46 = vld [vmem:[#allocation43_spill] sm:$0xff]  ;;  %v988_v38 = vld [vmem:[%s3589_s4 + $0x38] sm:$0xff] }
 0x2ea   :  { %1030 = vmatpush1.bf16.msra.mxu1 %v3766_v20  ;;  %v997_v34 = vadd.f32 %v981_v16, %v965_v22  ;;  %v969_v1 = vmul.f32 %v953_v36, %v3785_v31  ;;  %v970_v58 = vmul.f32 %v954_v40, %v3786_v15  ;;  %v986_v20 = vld [vmem:[%s3589_s4 + $0x28] sm:$0xff]  ;;  %v956_v32 = vmul.f32 %v3739_v59, %v940_v17  ;;  %v3790_v41 = vld [vmem:[#allocation21_spill] sm:$0xff]  ;;  %v3794_v16 = vld [vmem:[#allocation52_spill] sm:$0xff] }
 0x2eb   :  { %1031 = vmatprep.subr.bf16.mxu1 %v3767_v19  ;;  %v998_v28 = vadd.f32 %v982_v14, %v966_v13  ;;  %v999_v53 = vadd.f32 %v983_v26, %v967_v43  ;;  %v1000_v12 = vadd.f32 %v984_v8, %v968_v7  ;;  %v955_v19 = vmul.f32 %v3739_v59, %v939_v0  ;;  %v3791_v13 = vld [vmem:[#allocation22_spill] sm:$0xff]  ;;  %v3796_v62 = vld [vmem:[#allocation23_spill] sm:$0xff]  ;;  %v3798_v55 = vld [vmem:[#allocation25_spill] sm:$0xff] }
 0x2ec   :  { %v1001_v21 = vadd.f32 %v985_v4, %v969_v1  ;;  %v1002_v22 = vadd.f32 %v986_v20, %v970_v58  ;;  %v941_v14 = vmul.f32 %v3794_v16, %v3731_v23  ;;  %v3799_v29 = vld [vmem:[#allocation26_spill] sm:$0xff]  ;;  %v3800_v43 = vld [vmem:[#allocation56_spill] sm:$0xff]  ;;  %v3801_v24 = vld [vmem:[#allocation45_spill] sm:$0xff]  ;;  %v948_v16 = vmul.f32 %v2937_v27, %v3738_v57 }
 0x2ed   :  { %v3439_v61 = vpack.c.bf16 %v998_v28, %v997_v34  ;;  %v3461_v3 = vpack.c.bf16 %v1000_v12, %v999_v53  ;;  %v971_v56 = vmul.f32 %v955_v19, %v3792_v33  ;;  %v987_v28 = vld [vmem:[%s3589_s4 + $0x30] sm:$0xff]  ;;  %v943_v9 = vmul.f32 %v3800_v43, %v3733_v39  ;;  %v3803_v8 = vld [vmem:[#allocation58_spill] sm:$0xff]  ;;  %v989_v53 = vld [vmem:[%s3589_s4 + $0x40] sm:$0xff] }
 0x2ee   :  { %1032 = vmatpush1.bf16.msra.mxu1 %v3772_v48  ;;  %v3482_v60 = vpack.c.bf16 %v1002_v22, %v1001_v21  ;;  %v972_v48 = vmul.f32 %v956_v32, %v3793_v46  ;;  %v957_v23 = vmul.f32 %v3739_v59, %v941_v14  ;;  %v990_v12 = vld [vmem:[%s3589_s4 + $0x48] sm:$0xff]  ;;  %v3804_v36 = vld [vmem:[#allocation27_spill] sm:$0xff]  ;;  %v3805_v40 = vld [vmem:[#allocation28_spill] sm:$0xff] }
 0x2ef   :  { %1033 = vmatprep.subr.bf16.mxu1 %v3773_v25  ;;  %v3795_v25 = vld [vmem:[#allocation54_spill] sm:$0xff]  ;;  %v3808_v31 = vld [vmem:[#allocation60_spill] sm:$0xff]  ;;  %v3809_v58 = vld [vmem:[#allocation49_spill] sm:$0xff] }
 0x2f0   :  { %v942_v34 = vmul.f32 %v3795_v25, %v3732_v5  ;;  %v1004_v51 = vadd.f32 %v988_v38, %v972_v48  ;;  %v973_v37 = vmul.f32 %v957_v23, %v3801_v24  ;;  %v3807_v0 = vld [vmem:[#allocation30_spill] sm:$0xff]  ;;  %v945_v1 = vmul.f32 %v3808_v31, %v3735_v50  ;;  %v3810_v17 = vld [vmem:[#allocation51_spill] sm:$0xff]  ;;  %v3811_v4 = vld [vmem:[#allocation61_spill] sm:$0xff] }
 0x2f1   :  { %v946_v20 = vmul.f32 %v3811_v4, %v3736_v54  ;;  %v992_v19 = vld [vmem:[%s3589_s4 + $0x58] sm:$0xff]  ;;  %v3812_v21 = vld [vmem:[#allocation31_spill] sm:$0xff]  ;;  %v947_v54 = vmul.f32 %v2935_v47, %v3737_v6  ;;  %v3813_v33 = vld [vmem:[#allocation53_spill] sm:$0xff]  ;;  %v964_v6 = vmul.f32 %v3739_v59, %v948_v16 }
 0x2f2   :  { %1034 = vmatpush1.bf16.msra.mxu1 %v3774_v42  ;;  %v3797_v42 = vld [vmem:[#allocation24_spill] sm:$0xff]  ;;  %v958_v5 = vmul.f32 %v3739_v59, %v942_v34  ;;  %v1005_v39 = vadd.f32 %v989_v53, %v973_v37  ;;  %v961_v32 = vmul.f32 %v3739_v59, %v945_v1  ;;  %v3814_v46 = vld [vmem:[#allocation55_spill] sm:$0xff]  ;;  %v993_v14 = vld [vmem:[%s3589_s4 + $0x60] sm:$0xff] }
 0x2f3   :  { %1035 = vmatprep.subr.bf16.mxu1 %v3775_v44  ;;  %v1003_v44 = vadd.f32 %v987_v28, %v971_v56  ;;  %v994_v25 = vld [vmem:[%s3589_s4 + $0x68] sm:$0xff]  ;;  %v963_v47 = vmul.f32 %v3739_v59, %v947_v54  ;;  %v3816_v57 = vld [vmem:[#allocation59_spill] sm:$0xff] }
 0x2f4   :  { %v977_v56 = vmul.f32 %v961_v32, %v3813_v33 }
 0x2f5   :  { %v1016_v7 = vpack.c.bf16 %v1004_v51, %v1003_v44  ;;  %v995_v44 = vld [vmem:[%s3589_s4 + $0x70] sm:$0xff]  ;;  %v996_v51 = vld [vmem:[%s3589_s4 + $0x78] sm:$0xff] }
 0x2f6   :  { %1036 = vmatpush1.bf16.msra.mxu1 %v3780_v52  ;;  %v3802_v52 = vld [vmem:[#allocation47_spill] sm:$0xff]  ;;  %v1009_v34 = vadd.f32 %v993_v14, %v977_v56 }
 0x2f7   :  { %1134 = vmatprep.subr.bf16.mxu1 %v3781_v35  ;;  %v974_v26 = vmul.f32 %v958_v5, %v3802_v52  ;;  %v944_v35 = vmul.f32 %v3803_v8, %v3734_v49  ;;  %v3806_v49 = vld [vmem:[#allocation29_spill] sm:$0xff] }
 0x2f9   :  { %1054 = vmatmul.mubr.bf16.vlgmr.msra.gmra.mrb[0].mxu1 %v3439_v61  ;;  %v960_v18 = vmul.f32 %v3739_v59, %v944_v35 }
 0x2fa   :  { %1135 = vmatpush1.bf16.msra.mxu1 %v3782_v45  ;;  %1063 = vmatprep.mubr.bf16.mxu1 %v3759_v10  ;;  %v1006_v45 = vadd.f32 %v990_v12, %v974_v26 }
 0x2fb   :  { %1136 = vmatprep.subr.bf16.mxu1 %v3783_v63  ;;  %v959_v63 = vmul.f32 %v3739_v59, %v943_v9 }
 0x2fc   :  { %v1017_v15 = vpack.c.bf16 %v1006_v45, %v1005_v39 }
 0x2fd   :  { %v975_v11 = vmul.f32 %v959_v63, %v3809_v58 }
 0x2fe   :  { %1137 = vmatpush1.bf16.msra.mxu1 %v3788_v2  ;;  %v976_v2 = vmul.f32 %v960_v18, %v3810_v17 }
 0x2ff   :  { %1138 = vmatprep.subr.bf16.mxu1 %v3789_v30  ;;  %v991_v30 = vld [vmem:[%s3589_s4 + $0x50] sm:$0xff]  ;;  %s2275_s4 = smov [#allocation2]  }
 0x300   :  { %v1007_v50 = vadd.f32 %v991_v30, %v975_v11  ;;  %v1008_v22 = vadd.f32 %v992_v19, %v976_v2  ;;  %s1316_s6 = sshll.u32 %s2275_s4, 4  ;;  %s1317_s6 = int_to_ptr.vmem [resolvable:$true] %s1316_s6 }
 0x301   :  { %1064 = vmatmul.mubr.bf16.gmra.mrb[4].mxu1 %v3461_v3  ;;  %s1945_s7 = scalar_lea.vmem %s1317_s6, 8192  ;;  %p1950_p3 = scmp.lt.s32.totalorder %s1317_s6, %s1317_s6 }
 0x302   :  { %1073 = vmatprep.mubr.bf16.mxu1 %v3759_v10  ;;  %1139 = vmatpush1.bf16.msra.mxu1 %v3790_v41  ;;  %v962_v41 = vmul.f32 %v3739_v59, %v946_v20  ;;  %p1946_p2 = scmp.ne.s32.totalorder %s1317_s6, %s1945_s7  ;;  %p1951_p4 = scmp.lt.s32.totalorder %s1945_s7, %s1945_s7 }
 0x303   :  { %1140 = vmatprep.subr.bf16.mxu1 %v3791_v13  ;;  %v1018_v13 = vpack.c.bf16 %v1008_v22, %v1007_v50 }
 0x304   :  { %v978_v48 = vmul.f32 %v962_v41, %v3814_v46  ;;  %p1952_p5 = por %p1951_p4, %p1950_p3 }
 0x306   :  { %1141 = vmatpush1.bf16.msra.mxu1 %v3796_v62  ;;  %v1010_v28 = vadd.f32 %v994_v25, %v978_v48  ;;  %v3815_v62 = vld [vmem:[#allocation57_spill] sm:$0xff]  ;;  %p1953_p6 = pnand %p1952_p5, %p1946_p2 }
 0x307   :  { %1142 = vmatprep.subr.bf16.mxu1 %v3797_v42  ;;  %v979_v27 = vmul.f32 %v963_v47, %v3815_v62  ;;  %v980_v42 = vmul.f32 %v964_v6, %v3816_v57 }
 0x308   :  { %v1019_v38 = vpack.c.bf16 %v1010_v28, %v1009_v34 }
 0x309   :  { %1074 = vmatmul.mubr.bf16.gmra.mrb[8].mxu1 %v3482_v60  ;;  %v1011_v23 = vadd.f32 %v995_v44, %v979_v27  ;;  %v1012_v5 = vadd.f32 %v996_v51, %v980_v42 }
 0x30a   :  { %1083 = vmatprep.mubr.bf16.mxu1 %v3759_v10  ;;  %1143 = vmatpush1.bf16.msra.mxu1 %v3798_v55 }
 0x30b   :  { %1144 = vmatprep.subr.bf16.mxu1 %v3799_v29  ;;  %v1020_v59 = vpack.c.bf16 %v1012_v5, %v1011_v23 }
 0x30e   :  { %1145 = vmatpush1.bf16.msra.mxu1 %v3804_v36 }
 0x30f   :  { %1146 = vmatprep.subr.bf16.mxu1 %v3805_v40 }
 0x311   :  { %1084 = vmatmul.mubr.bf16.gmra.mrb[12].mxu1 %v1016_v7 }
 0x312   :  { %1093 = vmatprep.mubr.bf16.mxu1 %v3759_v10  ;;  %1147 = vmatpush1.bf16.msra.mxu1 %v3806_v49 }
 0x313   :  { %1148 = vmatprep.subr.bf16.mxu1 %v3807_v0 }
 0x316   :  { %1149 = vmatpush1.bf16.msra.mxu1 %v3812_v21 }
 0x319   :  { %1094 = vmatmul.mubr.bf16.gmra.mrb[16].mxu1 %v1017_v15 }
 0x31a   :  { %1103 = vmatprep.mubr.bf16.mxu1 %v3759_v10 }
 0x321   :  { %1104 = vmatmul.mubr.bf16.gmra.mrb[20].mxu1 %v1018_v13 }
 0x322   :  { %1113 = vmatprep.mubr.bf16.mxu1 %v3759_v10 }
 0x329   :  { %1114 = vmatmul.mubr.bf16.gmra.mrb[24].mxu1 %v1019_v38 }
 0x32a   :  { %1123 = vmatprep.mubr.bf16.mxu1 %v3759_v10 }
 0x331   :  { %1124 = vmatmul.mubr.bf16.gmra.mrb[28].mxu1 %v1020_v59 }
 0x332   :  { %1166 = vmatprep.mubr.bf16.mxu1 %v3759_v10 }
 0x339   :  { %1167 = vmatmul.mubr.bf16.vlgmr.msra.gmra.mrb[32].mxu1 %v3439_v61 }
 0x33a   :  { %1176 = vmatprep.mubr.bf16.mxu1 %v3759_v10 }
 0x341   :  { %1177 = vmatmul.mubr.bf16.gmra.mrb[36].mxu1 %v3461_v3 }
 0x342   :  { %1186 = vmatprep.mubr.bf16.mxu1 %v3759_v10 }
 0x349   :  { %1187 = vmatmul.mubr.bf16.gmra.mrb[40].mxu1 %v3482_v60 }
 0x34a   :  { %1196 = vmatprep.mubr.bf16.mxu1 %v3759_v10 }
 0x351   :  { %1197 = vmatmul.mubr.bf16.gmra.mrb[44].mxu1 %v1016_v7 }
 0x352   :  { %1206 = vmatprep.mubr.bf16.mxu1 %v3759_v10 }
 0x359   :  { %1207 = vmatmul.mubr.bf16.gmra.mrb[48].mxu1 %v1017_v15 }
 0x35a   :  { %1216 = vmatprep.mubr.bf16.mxu1 %v3759_v10 }
 0x361   :  { %1217 = vmatmul.mubr.bf16.gmra.mrb[52].mxu1 %v1018_v13 }
 0x362   :  { %1226 = vmatprep.mubr.bf16.mxu1 %v3759_v10 }
 0x369   :  { %1227 = vmatmul.mubr.bf16.gmra.mrb[56].mxu1 %v1019_v38 }
 0x36a   :  { %1236 = vmatprep.mubr.bf16.mxu1 %v3759_v10 }
 0x371   :  { %1237 = vmatmul.mubr.bf16.gmra.mrb[60].mxu1 %v1020_v59 }
 0x3cc   :  { %v1055_v61 = vpop.f32.mrb[0].mxu1 }
 0x3cd   :  { %1247 = vst [vmem:[#allocation2] sm:$0xff] %v1055_v61  ;;  %v1057_v3 = vpop.f32.mrb[1].mxu1 }
 0x3ce   :  { %1248 = vst [vmem:[#allocation2 + $0x8] sm:$0xff] %v1057_v3  ;;  %v1059_v60 = vpop.f32.mrb[2].mxu1 }
 0x3cf   :  { %1251 = vst [vmem:[#allocation2 + $0x20] sm:$0xff] %v1059_v60  ;;  %v1061_v55 = vpop.f32.mrb[3].mxu1 }
 0x3d0   :  { %1252 = vst [vmem:[#allocation2 + $0x28] sm:$0xff] %v1061_v55 }
 0x3d4   :  { %v1065_v29 = vpop.f32.mrb[4].mxu1 }
 0x3d5   :  { %1255 = vst [vmem:[#allocation2 + $0x40] sm:$0xff] %v1065_v29  ;;  %v1067_v43 = vpop.f32.mrb[5].mxu1 }
 0x3d6   :  { %1256 = vst [vmem:[#allocation2 + $0x48] sm:$0xff] %v1067_v43  ;;  %v1069_v9 = vpop.f32.mrb[6].mxu1 }
 0x3d7   :  { %1259 = vst [vmem:[#allocation2 + $0x60] sm:$0xff] %v1069_v9  ;;  %v1071_v7 = vpop.f32.mrb[7].mxu1 }
 0x3d8   :  { %1260 = vst [vmem:[#allocation2 + $0x68] sm:$0xff] %v1071_v7 }
 0x3dc   :  { %v1075_v24 = vpop.f32.mrb[8].mxu1 }
 0x3dd   :  { %1263 = vst [vmem:[#allocation2 + $0x80] sm:$0xff] %v1075_v24  ;;  %v1077_v10 = vpop.f32.mrb[9].mxu1 }
 0x3de   :  { %1264 = vst [vmem:[#allocation2 + $0x88] sm:$0xff] %v1077_v10  ;;  %v1079_v37 = vpop.f32.mrb[10].mxu1 }
 0x3df   :  { %1267 = vst [vmem:[#allocation2 + $0xa0] sm:$0xff] %v1079_v37  ;;  %v1081_v52 = vpop.f32.mrb[11].mxu1 }
 0x3e0   :  { %1268 = vst [vmem:[#allocation2 + $0xa8] sm:$0xff] %v1081_v52 }
 0x3e4   :  { %v1085_v26 = vpop.f32.mrb[12].mxu1 }
 0x3e5   :  { %1271 = vst [vmem:[#allocation2 + $0xc0] sm:$0xff] %v1085_v26  ;;  %v1087_v8 = vpop.f32.mrb[13].mxu1 }
 0x3e6   :  { %1272 = vst [vmem:[#allocation2 + $0xc8] sm:$0xff] %v1087_v8  ;;  %v1089_v35 = vpop.f32.mrb[14].mxu1 }
 0x3e7   :  { %1275 = vst [vmem:[#allocation2 + $0xe0] sm:$0xff] %v1089_v35  ;;  %v1091_v53 = vpop.f32.mrb[15].mxu1 }
 0x3e8   :  { %1276 = vst [vmem:[#allocation2 + $0xe8] sm:$0xff] %v1091_v53 }
 0x3ec   :  { %v1095_v12 = vpop.f32.mrb[16].mxu1 }
 0x3ed   :  { %1279 = vst [vmem:[#allocation2 + $0x100] sm:$0xff] %v1095_v12  ;;  %v1097_v36 = vpop.f32.mrb[17].mxu1 }
 0x3ee   :  { %1280 = vst [vmem:[#allocation2 + $0x108] sm:$0xff] %v1097_v36  ;;  %v1099_v40 = vpop.f32.mrb[18].mxu1 }
 0x3ef   :  { %1283 = vst [vmem:[#allocation2 + $0x120] sm:$0xff] %v1099_v40  ;;  %v1101_v39 = vpop.f32.mrb[19].mxu1 }
 0x3f0   :  { %1284 = vst [vmem:[#allocation2 + $0x128] sm:$0xff] %v1101_v39 }
 0x3f4   :  { %v1105_v45 = vpop.f32.mrb[20].mxu1 }
 0x3f5   :  { %1287 = vst [vmem:[#allocation2 + $0x140] sm:$0xff] %v1105_v45  ;;  %v1107_v63 = vpop.f32.mrb[21].mxu1 }
 0x3f6   :  { %1288 = vst [vmem:[#allocation2 + $0x148] sm:$0xff] %v1107_v63  ;;  %v1109_v18 = vpop.f32.mrb[22].mxu1 }
 0x3f7   :  { %1291 = vst [vmem:[#allocation2 + $0x160] sm:$0xff] %v1109_v18  ;;  %v1111_v49 = vpop.f32.mrb[23].mxu1 }
 0x3f8   :  { %1292 = vst [vmem:[#allocation2 + $0x168] sm:$0xff] %v1111_v49 }
 0x3fc   :  { %v1115_v0 = vpop.f32.mrb[24].mxu1 }
 0x3fd   :  { %1295 = vst [vmem:[#allocation2 + $0x180] sm:$0xff] %v1115_v0  ;;  %v1117_v31 = vpop.f32.mrb[25].mxu1 }
 0x3fe   :  { %1296 = vst [vmem:[#allocation2 + $0x188] sm:$0xff] %v1117_v31  ;;  %v1119_v1 = vpop.f32.mrb[26].mxu1 }
 0x3ff   :  { %1299 = vst [vmem:[#allocation2 + $0x1a0] sm:$0xff] %v1119_v1  ;;  %v1121_v15 = vpop.f32.mrb[27].mxu1 }
 0x400   :  { %1300 = vst [vmem:[#allocation2 + $0x1a8] sm:$0xff] %v1121_v15 }
 0x404   :  { %v1125_v58 = vpop.f32.mrb[28].mxu1 }
 0x405   :  { %1303 = vst [vmem:[#allocation2 + $0x1c0] sm:$0xff] %v1125_v58  ;;  %v1127_v11 = vpop.f32.mrb[29].mxu1 }
 0x406   :  { %1304 = vst [vmem:[#allocation2 + $0x1c8] sm:$0xff] %v1127_v11  ;;  %v1129_v17 = vpop.f32.mrb[30].mxu1 }
 0x407   :  { %1307 = vst [vmem:[#allocation2 + $0x1e0] sm:$0xff] %v1129_v17  ;;  %v1131_v2 = vpop.f32.mrb[31].mxu1 }
 0x408   :  { %1308 = vst [vmem:[#allocation2 + $0x1e8] sm:$0xff] %v1131_v2 }
 0x40c   :  { %v1168_v4 = vpop.f32.mrb[32].mxu1 }
 0x40d   :  { %1249 = vst [vmem:[#allocation2 + $0x10] sm:$0xff] %v1168_v4  ;;  %v1170_v20 = vpop.f32.mrb[33].mxu1 }
 0x40e   :  { %1250 = vst [vmem:[#allocation2 + $0x18] sm:$0xff] %v1170_v20  ;;  %v1172_v30 = vpop.f32.mrb[34].mxu1 }
 0x40f   :  { %1253 = vst [vmem:[#allocation2 + $0x30] sm:$0xff] %v1172_v30  ;;  %v1174_v19 = vpop.f32.mrb[35].mxu1 }
 0x410   :  { %1254 = vst [vmem:[#allocation2 + $0x38] sm:$0xff] %v1174_v19 }
 0x414   :  { %v1178_v21 = vpop.f32.mrb[36].mxu1 }
 0x415   :  { %1257 = vst [vmem:[#allocation2 + $0x50] sm:$0xff] %v1178_v21  ;;  %v1180_v50 = vpop.f32.mrb[37].mxu1 }
 0x416   :  { %1258 = vst [vmem:[#allocation2 + $0x58] sm:$0xff] %v1180_v50  ;;  %v1182_v22 = vpop.f32.mrb[38].mxu1 }
 0x417   :  { %1261 = vst [vmem:[#allocation2 + $0x70] sm:$0xff] %v1182_v22  ;;  %v1184_v32 = vpop.f32.mrb[39].mxu1 }
 0x418   :  { %1262 = vst [vmem:[#allocation2 + $0x78] sm:$0xff] %v1184_v32 }
 0x41c   :  { %v1188_v41 = vpop.f32.mrb[40].mxu1 }
 0x41d   :  { %1265 = vst [vmem:[#allocation2 + $0x90] sm:$0xff] %v1188_v41  ;;  %v1190_v54 = vpop.f32.mrb[41].mxu1 }
 0x41e   :  { %1266 = vst [vmem:[#allocation2 + $0x98] sm:$0xff] %v1190_v54  ;;  %v1192_v13 = vpop.f32.mrb[42].mxu1 }
 0x41f   :  { %1269 = vst [vmem:[#allocation2 + $0xb0] sm:$0xff] %v1192_v13  ;;  %v1194_v33 = vpop.f32.mrb[43].mxu1 }
 0x420   :  { %1270 = vst [vmem:[#allocation2 + $0xb8] sm:$0xff] %v1194_v33 }
 0x424   :  { %v1198_v56 = vpop.f32.mrb[44].mxu1 }
 0x425   :  { %1273 = vst [vmem:[#allocation2 + $0xd0] sm:$0xff] %v1198_v56  ;;  %v1200_v46 = vpop.f32.mrb[45].mxu1 }
 0x426   :  { %1274 = vst [vmem:[#allocation2 + $0xd8] sm:$0xff] %v1200_v46  ;;  %v1202_v48 = vpop.f32.mrb[46].mxu1 }
 0x427   :  { %1277 = vst [vmem:[#allocation2 + $0xf0] sm:$0xff] %v1202_v48  ;;  %v1204_v16 = vpop.f32.mrb[47].mxu1 }
 0x428   :  { %1278 = vst [vmem:[#allocation2 + $0xf8] sm:$0xff] %v1204_v16 }
 0x42c   :  { %v1208_v14 = vpop.f32.mrb[48].mxu1 }
 0x42d   :  { %1281 = vst [vmem:[#allocation2 + $0x110] sm:$0xff] %v1208_v14  ;;  %v1210_v25 = vpop.f32.mrb[49].mxu1 }
 0x42e   :  { %1282 = vst [vmem:[#allocation2 + $0x118] sm:$0xff] %v1210_v25  ;;  %v1212_v34 = vpop.f32.mrb[50].mxu1 }
 0x42f   :  { %1285 = vst [vmem:[#allocation2 + $0x130] sm:$0xff] %v1212_v34  ;;  %v1214_v28 = vpop.f32.mrb[51].mxu1 }
 0x430   :  { %1286 = vst [vmem:[#allocation2 + $0x138] sm:$0xff] %v1214_v28 }
 0x434   :  { %v1218_v47 = vpop.f32.mrb[52].mxu1 }
 0x435   :  { %1289 = vst [vmem:[#allocation2 + $0x150] sm:$0xff] %v1218_v47  ;;  %v1220_v6 = vpop.f32.mrb[53].mxu1 }
 0x436   :  { %1290 = vst [vmem:[#allocation2 + $0x158] sm:$0xff] %v1220_v6  ;;  %v1222_v38 = vpop.f32.mrb[54].mxu1 }
 0x437   :  { %1293 = vst [vmem:[#allocation2 + $0x170] sm:$0xff] %v1222_v38  ;;  %v1224_v62 = vpop.f32.mrb[55].mxu1 }
 0x438   :  { %1294 = vst [vmem:[#allocation2 + $0x178] sm:$0xff] %v1224_v62 }
 0x43c   :  { %v1228_v27 = vpop.f32.mrb[56].mxu1 }
 0x43d   :  { %1297 = vst [vmem:[#allocation2 + $0x190] sm:$0xff] %v1228_v27  ;;  %v1230_v57 = vpop.f32.mrb[57].mxu1 }
 0x43e   :  { %1298 = vst [vmem:[#allocation2 + $0x198] sm:$0xff] %v1230_v57  ;;  %v1232_v42 = vpop.f32.mrb[58].mxu1 }
 0x43f   :  { %1301 = vst [vmem:[#allocation2 + $0x1b0] sm:$0xff] %v1232_v42  ;;  %v1234_v44 = vpop.f32.mrb[59].mxu1 }
 0x440   :  { %1302 = vst [vmem:[#allocation2 + $0x1b8] sm:$0xff] %v1234_v44 }
 0x444   :  { %v1238_v51 = vpop.f32.mrb[60].mxu1 }
 0x445   :  { %1305 = vst [vmem:[#allocation2 + $0x1d0] sm:$0xff] %v1238_v51  ;;  %v1240_v23 = vpop.f32.mrb[61].mxu1 }
 0x446   :  { %1306 = vst [vmem:[#allocation2 + $0x1d8] sm:$0xff] %v1240_v23  ;;  %v1242_v5 = vpop.f32.mrb[62].mxu1 }
 0x447   :  { %1309 = vst [vmem:[#allocation2 + $0x1f0] sm:$0xff] %v1242_v5  ;;  %v1244_v59 = vpop.f32.mrb[63].mxu1 }
 0x448   :  { %1310 = vst [vmem:[#allocation2 + $0x1f8] sm:$0xff] %v1244_v59 }
 0x449   :  { %1956 = shalt.err (!%p1953_p6)
}
 0x44a   :  { %s1957_s10 = scalar_lea.hbm %s3590_s5, 8192 }
 0x44b   :  { %p1958_p7 = scmp.ne.s32.totalorder %s3590_s5, %s1957_s10  ;;  %p1961_p8 = scmp.lt.u32.totalorder %s1957_s10, %s3590_s5 }
 0x44d   :  { %p1963_p9 = pnand %p1961_p8, %p1958_p7 }
 0x44f   :  { %1966 = shalt.err (!%p1963_p9)
}
 0x450   :  { %s2276_s15 = smov 512   ;;  %s2277_s16 = smov 32  }
 0x451   :  { %1322 = dma.vmem_to_hbm [thread:$0]  %s1317_s6, 8192, %s3590_s5, [#allocation3], %s2276_s15, %s2276_s15, %s2277_s16  }
 0x452   :  { %2115 = dma.done.wait [#allocation3], 8192  }
 0x453   :  { %2116 = vsyncadd [#allocation3], 4294959104 }
 0x454   :  { %1326 = vsyncpa [#allocation3], 1 }

</bundles_post_ra>
